<compile_context>
chip_gen: v6e
topology: v6e:2x2x1
jax: 0.10.0
libtpu: 0.0.40
codegen_flags: <defaults>
</compile_context>

<pallas_src>
import functools
import numpy as np
import jax
import jax.numpy as jnp
from jax.experimental import pallas as pl
from jax.experimental.pallas import tpu as pltpu

SUBLANE = 8


def _round_up(n, m):
    return ((n + m - 1) // m) * m


# ----------------------------------------------------------------------------
# Kernel 1: fused multi-cell (fwd + bwd x branches) single-layer LSTM recurrence
# ----------------------------------------------------------------------------

def _fused_lstm_kernel(gx_ref, whh_ref, mask_ref, out_ref, *, hidden_cat, seq_len):
    """All LSTM cells of one (multi-branch) BiLSTM layer run in lock-step over time.

    gx_ref  : (T, B, 4*Hcat)  precomputed input projections (+ bias), gate-type-major
              layout [i_c0..i_c{C-1} | f_.. | g_.. | o_..]; backward-cell columns are
              already time-reversed so every cell reads gx_ref[t] at loop step t.
    whh_ref : (Hcat, 4*Hcat)  block-structured recurrent weights (same column layout).
    mask_ref: (T, B, Hcat)    1.0 inside the packed sequence for that cell, 0.0 on pad.
    out_ref : (T, B, Hcat)    hidden states (0 on padding).  Backward-cell columns are
              stored in processing order (time-reversed); the wrapper flips them back.
    """
    hc = hidden_cat
    b = out_ref.shape[1]

    def step(t, carry):
        h, c = carry                                             # (B, Hcat) each
        gates = gx_ref[t] + jnp.dot(h, whh_ref[...],
                                    preferred_element_type=jnp.float32)  # (B, 4*Hcat)
        i_g = jax.nn.sigmoid(gates[:, 0 * hc:1 * hc])
        f_g = jax.nn.sigmoid(gates[:, 1 * hc:2 * hc])
        g_g = jnp.tanh(gates[:, 2 * hc:3 * hc])
        o_g = jax.nn.sigmoid(gates[:, 3 * hc:4 * hc])
        c_new = f_g * c + i_g * g_g
        h_new = o_g * jnp.tanh(c_new)
        valid = mask_ref[t] != 0.0                               # (B, Hcat) bool
        out_ref[t] = jnp.where(valid, h_new, 0.0).astype(out_ref.dtype)
        return jnp.where(valid, h_new, h), jnp.where(valid, c_new, c)

    init = (jnp.zeros((b, hc), jnp.float32), jnp.zeros((b, hc), jnp.float32))
    jax.lax.fori_loop(0, seq_len, step, init, unroll=True)


def fused_bilstm_layer(x_bf, lengths, fused):
    """One BiLSTM layer over shared input `x_bf` for every branch packed in `fused`.

    x_bf: (B, T, E) batch-first.  Returns a list with one (B, T, 2H) output per branch.
    """
    B, T, _ = x_bf.shape
    H = fused['H']
    C = fused['ncell']
    Hcat = C * H

    # Hoisted input projection: one (B*T, E) @ (E, 4*Hcat) contraction for the whole
    # sequence and all cells — the recurrence only does h @ W_hh.
    gx = jnp.einsum('bte,eg->tbg', x_bf, fused['wih']) + fused['b']      # (T, B, 4*Hcat)
    # Time-reverse the backward-cell columns so the kernel reads gx[t] for every cell.
    bwd_cols = jnp.asarray(((np.arange(4 * Hcat) // H) % C) % 2 == 1)
    gx = jnp.where(bwd_cols[None, None, :], gx[::-1], gx)

    # Per-cell validity mask (pack_padded_sequence semantics via masking).
    t_idx = jnp.arange(T)[:, None]                                       # (T, 1)
    len_row = lengths[None, :].astype(jnp.int32)                         # (1, B)
    m_f = (t_idx < len_row).astype(jnp.float32)                          # (T, B)
    m_b = ((T - 1 - t_idx) < len_row).astype(jnp.float32)                # (T, B)
    cell_masks = [jnp.broadcast_to((m_f if c % 2 == 0 else m_b)[:, :, None], (T, B, H))
                  for c in range(C)]
    mask = jnp.concatenate(cell_masks, axis=-1)                          # (T, B, Hcat)

    out_tm = pl.pallas_call(
        functools.partial(_fused_lstm_kernel, hidden_cat=Hcat, seq_len=T),
        out_shape=jax.ShapeDtypeStruct((T, B, Hcat), jnp.float32),
        in_specs=[pl.BlockSpec(memory_space=pltpu.MemorySpace.VMEM)] * 3,
        out_specs=pl.BlockSpec(memory_space=pltpu.MemorySpace.VMEM),
    )(gx, fused['whh'], mask)

    outs = []
    for br in range(C // 2):
        fwd = out_tm[:, :, (2 * br) * H:(2 * br + 1) * H]
        bwd = out_tm[::-1, :, (2 * br + 1) * H:(2 * br + 2) * H]          # undo reversal
        outs.append(jnp.transpose(jnp.concatenate([fwd, bwd], axis=-1), (1, 0, 2)))
    return outs


# ----------------------------------------------------------------------------
# Kernel 2: sentence-stage epilogue (metaphor classifier + sentence attention)
# ----------------------------------------------------------------------------

def _sentence_epilogue_kernel(meta_ref, hyp_ref, mask_ref, aw_ref, ab_ref,
                              cw_ref, cb_ref, pred_ref, rep_ref):
    # Per-token metaphor classifier: log_softmax(meta @ W + b)   (MXU matmul)
    logits = jnp.dot(meta_ref[...], cw_ref[...],
                     preferred_element_type=jnp.float32) + cb_ref[...]    # (B*T, 2)
    m = jnp.max(logits, axis=-1, keepdims=True)
    lse = m + jnp.log(jnp.sum(jnp.exp(logits - m), axis=-1, keepdims=True))
    pred_ref[...] = (logits - lse).astype(pred_ref.dtype)

    # Masked self-attention pooling on the hyper branch (scores output dropped).
    hx = hyp_ref[...]                                                     # (B, T, D)
    z = jnp.tanh(jnp.sum(hx * aw_ref[...], axis=-1) + ab_ref[0, 0])       # (B, T)
    zm = jnp.max(z, axis=-1, keepdims=True)
    e = jnp.exp(z - zm)
    sm = e / jnp.sum(e, axis=-1, keepdims=True)                           # softmax over T
    masked = sm * mask_ref[...]
    denom = jnp.sum(masked, axis=-1, keepdims=True)
    scores = masked / jnp.where(denom > 0.0, denom, 1.0)                  # zero-length safe
    rep_ref[...] = jnp.sum(hx * scores[..., None], axis=1).astype(rep_ref.dtype)


def sentence_epilogue(out_meta, out_hyper, lengths, attn_w, attn_b, cls_w, cls_b):
    B, T, Dm = out_meta.shape
    Dh = out_hyper.shape[-1]
    mask = (jnp.arange(T)[None, :] < lengths[:, None].astype(jnp.int32)).astype(jnp.float32)
    pred2d, rep = pl.pallas_call(
        _sentence_epilogue_kernel,
        out_shape=(jax.ShapeDtypeStruct((B * T, cls_w.shape[-1]), jnp.float32),
                   jax.ShapeDtypeStruct((B, Dh), jnp.float32)),
        in_specs=[pl.BlockSpec(memory_space=pltpu.MemorySpace.VMEM)] * 7,
        out_specs=(pl.BlockSpec(memory_space=pltpu.MemorySpace.VMEM),
                   pl.BlockSpec(memory_space=pltpu.MemorySpace.VMEM)),
    )(out_meta.reshape(B * T, Dm), out_hyper, mask, attn_w, attn_b, cls_w, cls_b)
    return pred2d.reshape(B, T, -1), rep


# ----------------------------------------------------------------------------
# Kernel 3: doc-stage epilogue (doc attention pooling + doc classifier)
# ----------------------------------------------------------------------------

def _doc_epilogue_kernel(x_ref, mask_ref, aw_ref, ab_ref, cw_ref, cb_ref, pred_ref):
    hx = x_ref[...]                                                       # (Nd, Td, D)
    z = jnp.tanh(jnp.sum(hx * aw_ref[...], axis=-1) + ab_ref[0, 0])       # (Nd, Td)
    zm = jnp.max(z, axis=-1, keepdims=True)
    e = jnp.exp(z - zm)
    sm = e / jnp.sum(e, axis=-1, keepdims=True)
    masked = sm * mask_ref[...]
    denom = jnp.sum(masked, axis=-1, keepdims=True)
    scores = masked / jnp.where(denom > 0.0, denom, 1.0)
    rep = jnp.sum(hx * scores[..., None], axis=1)                         # (Nd, D)
    logits = jnp.dot(rep, cw_ref[...], preferred_element_type=jnp.float32) + cb_ref[...]
    m = jnp.max(logits, axis=-1, keepdims=True)
    lse = m + jnp.log(jnp.sum(jnp.exp(logits - m), axis=-1, keepdims=True))
    pred_ref[...] = (logits - lse).astype(pred_ref.dtype)


def doc_epilogue(out_doc, doc_lengths, attn_w, attn_b, cls_w, cls_b):
    Nd, Td, _ = out_doc.shape
    mask = (jnp.arange(Td)[None, :] < doc_lengths[:, None].astype(jnp.int32)).astype(jnp.float32)
    return pl.pallas_call(
        _doc_epilogue_kernel,
        out_shape=jax.ShapeDtypeStruct((Nd, cls_w.shape[-1]), jnp.float32),
        in_specs=[pl.BlockSpec(memory_space=pltpu.MemorySpace.VMEM)] * 6,
        out_specs=pl.BlockSpec(memory_space=pltpu.MemorySpace.VMEM),
    )(out_doc, mask, attn_w, attn_b, cls_w, cls_b)


# ----------------------------------------------------------------------------
# Forward pass (module-level glue, eval mode)
# ----------------------------------------------------------------------------

def multitask_soft_model_forward(params, input_data, length_data, length_doc, is_doc=True):
    N, T, _ = input_data.shape
    B = _round_up(N, SUBLANE)                       # pad batch to the sublane quantum
    x = jnp.pad(input_data, ((0, B - N), (0, 0), (0, 0)))
    lengths = jnp.pad(length_data.astype(jnp.int32), (0, B - N))

    # --- sentence stage: meta + hyper BiLSTM encoders (layer 0 fused: 1 pallas_call) ---
    out_meta, out_hyper = fused_bilstm_layer(x, lengths, params['sent_layer0'])
    for lp in params['meta_rest']:
        (out_meta,) = fused_bilstm_layer(out_meta, lengths, lp)
    for lp in params['hyper_rest']:
        (out_hyper,) = fused_bilstm_layer(out_hyper, lengths, lp)

    # --- sentence epilogue: per-token metaphor classifier + sentence attention ---
    meta_pred, averaged_docs = sentence_epilogue(
        out_meta, out_hyper, lengths,
        params['attn_sent_w'], params['attn_sent_b'],
        params['meta_fcl_w'], params['meta_fcl_b'])
    meta_pred = meta_pred[:N]

    hyp_pred = None
    if is_doc:
        # torch.split + pad_sequence replaced by a single gather + validity mask.
        doc_lengths = tuple(int(v) for v in np.asarray(length_doc))
        nd = len(doc_lengths)
        max_dl = max(doc_lengths)
        offsets = np.concatenate([[0], np.cumsum(doc_lengths)[:-1]]).astype(np.int32)
        idx = offsets[:, None] + np.arange(max_dl, dtype=np.int32)[None, :]
        valid = np.arange(max_dl)[None, :] < np.asarray(doc_lengths)[:, None]
        idx = np.where(valid, idx, 0)
        docs = averaged_docs[jnp.asarray(idx)] * jnp.asarray(valid, jnp.float32)[..., None]

        NDp = _round_up(nd, SUBLANE)
        docs = jnp.pad(docs, ((0, NDp - nd), (0, 0), (0, 0)))
        doc_len = jnp.asarray(list(doc_lengths) + [0] * (NDp - nd), jnp.int32)

        # --- doc-level BiLSTM + attention + classifier ---
        out_doc = docs
        for lp in params['doc_layers']:
            (out_doc,) = fused_bilstm_layer(out_doc, doc_len, lp)
        hyp_pred = doc_epilogue(out_doc, doc_len,
                                params['attn_doc_w'], params['attn_doc_b'],
                                params['doc_fcl_w'], params['doc_fcl_b'])[:nd]
    return meta_pred, hyp_pred


# ----------------------------------------------------------------------------
# Deterministic parameter init (synthetic; shapes follow the module __init__)
# ----------------------------------------------------------------------------

def _init_lstm_dir(key, e, h, scale=0.1):
    k1, k2, k3 = jax.random.split(key, 3)
    return dict(
        wih=scale * jax.random.normal(k1, (e, 4 * h), jnp.float32),   # W_ih^T, gates i,f,g,o
        whh=scale * jax.random.normal(k2, (h, 4 * h), jnp.float32),   # W_hh^T
        b=scale * jax.random.normal(k3, (1, 4 * h), jnp.float32))     # b_ih + b_hh


def _init_bilstm(key, e, h, layers):
    out = []
    in_dim = e
    for _ in range(layers):
        key, kf, kb = jax.random.split(key, 3)
        pf = _init_lstm_dir(kf, in_dim, h)
        pb = _init_lstm_dir(kb, in_dim, h)
        out.append(dict(wih_f=pf['wih'], whh_f=pf['whh'], b_f=pf['b'],
                        wih_b=pb['wih'], whh_b=pb['whh'], b_b=pb['b']))
        in_dim = 2 * h
    return out


def fuse_bilstm_branches(branches, H):
    """Pack per-direction PyTorch-layout LSTM weights into the fused, gate-type-major
    layout consumed by _fused_lstm_kernel (cell order: b0_fwd, b0_bwd, b1_fwd, ...)."""
    C = 2 * len(branches)
    Hcat = C * H
    wih_cells, whh_cells, b_cells = [], [], []
    for br in branches:
        wih_cells += [br['wih_f'], br['wih_b']]
        whh_cells += [br['whh_f'], br['whh_b']]
        b_cells += [br['b_f'], br['b_b']]
    wih_cols, b_cols = [], []
    whh = jnp.zeros((Hcat, 4 * Hcat), jnp.float32)
    for k in range(4):                      # gate type: i, f, g, o (PyTorch order)
        for c in range(C):
            wih_cols.append(wih_cells[c][:, k * H:(k + 1) * H])
            b_cols.append(b_cells[c][:, k * H:(k + 1) * H])
            whh = whh.at[c * H:(c + 1) * H,
                         (k * C + c) * H:(k * C + c + 1) * H].set(
                             whh_cells[c][:, k * H:(k + 1) * H])
    return dict(wih=jnp.concatenate(wih_cols, axis=1),    # (E, 4*Hcat)
                whh=whh,                                  # (Hcat, 4*Hcat)
                b=jnp.concatenate(b_cols, axis=1),        # (1, 4*Hcat)
                H=H, ncell=C)


def _init_linear(key, din, dout, scale=0.1):
    kw, kb = jax.random.split(key)
    w = scale * jax.random.normal(kw, (din, dout), jnp.float32)
    b = scale * jax.random.normal(kb, (1, dout), jnp.float32)
    return w, b


def init_multitask_soft_model(key, encoder_param, hyper_param, meta_param):
    E = encoder_param['embed_dim']
    H_enc = encoder_param['hidden_dim']
    L_enc = encoder_param['layers']
    H_hyp = hyper_param['hidden_dim']       # == 2 * H_enc
    L_hyp = hyper_param['layers']

    keys = jax.random.split(key, 8)
    meta_layers = _init_bilstm(keys[0], E, H_enc, L_enc)
    hyper_layers = _init_bilstm(keys[1], E, H_enc, L_enc)
    doc_layers = _init_bilstm(keys[2], H_hyp, H_hyp, L_hyp)

    params = {}
    # Layer 0 of the meta & hyper encoders shares the input -> fused 4-cell kernel call.
    params['sent_layer0'] = fuse_bilstm_branches([meta_layers[0], hyper_layers[0]], H_enc)
    params['meta_rest'] = [fuse_bilstm_branches([l], H_enc) for l in meta_layers[1:]]
    params['hyper_rest'] = [fuse_bilstm_branches([l], H_enc) for l in hyper_layers[1:]]
    params['doc_layers'] = [fuse_bilstm_branches([l], H_hyp) for l in doc_layers]

    # MetaphorModel.metafor_classifier.fcl: Linear(2*meta_hidden, 2)
    params['meta_fcl_w'], params['meta_fcl_b'] = _init_linear(
        keys[3], 2 * meta_param['hidden_dim'], 2)
    # HyperSoftModel.self_attention_sentence: Linear(H_hyp, 1) + Tanh
    w, b = _init_linear(keys[4], H_hyp, 1)
    params['attn_sent_w'], params['attn_sent_b'] = w.reshape(1, H_hyp), b.reshape(1, 1)
    # HyperSoftModel.self_attention: Linear(2*H_hyp, 1) + Tanh
    w, b = _init_linear(keys[5], 2 * H_hyp, 1)
    params['attn_doc_w'], params['attn_doc_b'] = w.reshape(1, 2 * H_hyp), b.reshape(1, 1)
    # HyperSoftModel.doc_classifier.fcl: Linear(2*H_hyp, 2)
    params['doc_fcl_w'], params['doc_fcl_b'] = _init_linear(keys[6], 2 * H_hyp, 2)
    return params


# ----------------------------------------------------------------------------
# Driver
# ----------------------------------------------------------------------------

if __name__ == "__main__":
    key = jax.random.PRNGKey(0)

    encoder_param = dict(embed_dim=16, hidden_dim=16, layers=1,
                         dropout_lstm=0.0, dropout_input=0.2)
    meta_param = dict(hidden_dim=16, dropout_FC=0.2)             # Linear(32, 2)
    hyper_param = dict(hidden_dim=32, layers=1, dropout_FC=0.2,
                       dropout_lstm_hyper=0.0)                   # 32 == 2 * H_enc

    N_sent, S = 6, 8
    key, kx, kp = jax.random.split(key, 3)
    input_data = jax.random.normal(kx, (N_sent, S, encoder_param['embed_dim']),
                                   jnp.float32)
    length_data = jnp.array([8, 5, 7, 3, 6, 4], jnp.int32)       # per-sentence lengths
    length_doc = np.array([2, 3, 1], np.int64)                   # sentences per doc

    params = init_multitask_soft_model(kp, encoder_param, hyper_param, meta_param)

    meta_pred, hyp_pred = multitask_soft_model_forward(
        params, input_data, length_data, length_doc, is_doc=True)
    jax.block_until_ready(meta_pred)
    jax.block_until_ready(hyp_pred)

    assert meta_pred.shape == (N_sent, S, 2)
    assert hyp_pred.shape == (len(length_doc), 2)
    # log-softmax sanity: rows sum to ~1 in prob space
    assert np.allclose(np.exp(np.asarray(meta_pred)).sum(-1), 1.0, atol=1e-4)
    assert np.allclose(np.exp(np.asarray(hyp_pred)).sum(-1), 1.0, atol=1e-4)

    print("KERNEL_OK")
</pallas_src>

<mosaic_0001>
module attributes {stable_mosaic.version = 11 : i64} {
  func.func @_fused_lstm_kernel(%arg0: memref<8x8x256xf32, #tpu.memory_space<vmem>>, %arg1: memref<64x256xf32, #tpu.memory_space<vmem>>, %arg2: memref<8x8x64xf32, #tpu.memory_space<vmem>>, %arg3: memref<8x8x64xf32, #tpu.memory_space<vmem>>) attributes {dimension_semantics = [], scalar_prefetch = 0 : i64, scratch_operands = 0 : i64, tpu.core_type = #tpu.core_type<tc>} {
    %cst = arith.constant 0.000000e+00 : f32
    %0 = vector.broadcast %cst : f32 to vector<8x64xf32>
    %cst_0 = arith.constant 0.000000e+00 : f32
    %1 = vector.broadcast %cst_0 : f32 to vector<8x64xf32>
    %c0_i32 = arith.constant 0 : i32
    %2 = arith.index_cast %c0_i32 : i32 to index
    %c0 = arith.constant 0 : index
    %c0_1 = arith.constant 0 : index
    %3 = vector.load %arg0[%2, %c0, %c0_1] : memref<8x8x256xf32, #tpu.memory_space<vmem>>, vector<1x8x256xf32>
    %4 = vector.shape_cast %3 : vector<1x8x256xf32> to vector<8x256xf32>
    %c0_2 = arith.constant 0 : index
    %c0_3 = arith.constant 0 : index
    %5 = vector.load %arg1[%c0_2, %c0_3] : memref<64x256xf32, #tpu.memory_space<vmem>>, vector<64x256xf32>
    %cst_4 = arith.constant dense<0.000000e+00> : vector<8x256xf32>
    %6 = tpu.matmul %0, %5, %cst_4 {dimension_numbers = #tpu.dot_dimension_numbers<[1], [0], [0], [1], [0, 0, 1, 1], [], []>} : vector<8x64xf32>, vector<64x256xf32>, vector<8x256xf32> -> vector<8x256xf32>
    %7 = arith.addf %4, %6 : vector<8x256xf32>
    %8 = vector.extract_strided_slice %7 {offsets = [0, 0], sizes = [8, 64], strides = [1, 1]} : vector<8x256xf32> to vector<8x64xf32>
    %9 = arith.negf %8 : vector<8x64xf32>
    %10 = math.exp %9 : vector<8x64xf32>
    %cst_5 = arith.constant 1.000000e+00 : f32
    %11 = vector.broadcast %cst_5 : f32 to vector<8x64xf32>
    %12 = arith.addf %11, %10 : vector<8x64xf32>
    %13 = arith.divf %11, %12 : vector<8x64xf32>
    %14 = vector.extract_strided_slice %7 {offsets = [0, 64], sizes = [8, 64], strides = [1, 1]} : vector<8x256xf32> to vector<8x64xf32>
    %15 = arith.negf %14 : vector<8x64xf32>
    %16 = math.exp %15 : vector<8x64xf32>
    %cst_6 = arith.constant 1.000000e+00 : f32
    %17 = vector.broadcast %cst_6 : f32 to vector<8x64xf32>
    %18 = arith.addf %17, %16 : vector<8x64xf32>
    %19 = arith.divf %17, %18 : vector<8x64xf32>
    %20 = vector.extract_strided_slice %7 {offsets = [0, 128], sizes = [8, 64], strides = [1, 1]} : vector<8x256xf32> to vector<8x64xf32>
    %21 = math.tanh %20 : vector<8x64xf32>
    %22 = vector.extract_strided_slice %7 {offsets = [0, 192], sizes = [8, 64], strides = [1, 1]} : vector<8x256xf32> to vector<8x64xf32>
    %23 = arith.negf %22 : vector<8x64xf32>
    %24 = math.exp %23 : vector<8x64xf32>
    %cst_7 = arith.constant 1.000000e+00 : f32
    %25 = vector.broadcast %cst_7 : f32 to vector<8x64xf32>
    %26 = arith.addf %25, %24 : vector<8x64xf32>
    %27 = arith.divf %25, %26 : vector<8x64xf32>
    %28 = arith.mulf %19, %1 : vector<8x64xf32>
    %29 = arith.mulf %13, %21 : vector<8x64xf32>
    %30 = arith.addf %28, %29 : vector<8x64xf32>
    %31 = math.tanh %30 : vector<8x64xf32>
    %32 = arith.mulf %27, %31 : vector<8x64xf32>
    %33 = arith.index_cast %c0_i32 : i32 to index
    %c0_8 = arith.constant 0 : index
    %c0_9 = arith.constant 0 : index
    %34 = vector.load %arg2[%33, %c0_8, %c0_9] : memref<8x8x64xf32, #tpu.memory_space<vmem>>, vector<1x8x64xf32>
    %35 = vector.shape_cast %34 : vector<1x8x64xf32> to vector<8x64xf32>
    %cst_10 = arith.constant 0.000000e+00 : f32
    %36 = vector.broadcast %cst_10 : f32 to vector<8x64xf32>
    %37 = arith.cmpf one, %35, %36 : vector<8x64xf32>
    %cst_11 = arith.constant 0.000000e+00 : f32
    %38 = vector.broadcast %cst_11 : f32 to vector<8x64xf32>
    %39 = arith.select %37, %32, %38 : vector<8x64xi1>, vector<8x64xf32>
    %40 = arith.index_cast %c0_i32 : i32 to index
    %c0_12 = arith.constant 0 : index
    %c0_13 = arith.constant 0 : index
    %41 = vector.load %arg3[%40, %c0_12, %c0_13] : memref<8x8x64xf32, #tpu.memory_space<vmem>>, vector<1x8x64xf32>
    %42 = vector.shape_cast %41 : vector<1x8x64xf32> to vector<8x64xf32>
    %43 = vector.shape_cast %39 : vector<8x64xf32> to vector<1x8x64xf32>
    tpu.vector_store %arg3[%40, %c0_12, %c0_13], %43 {strides = array<i32>} : memref<8x8x64xf32, #tpu.memory_space<vmem>>, vector<1x8x64xf32>,
    %44 = arith.select %37, %32, %0 : vector<8x64xi1>, vector<8x64xf32>
    %45 = arith.select %37, %30, %1 : vector<8x64xi1>, vector<8x64xf32>
    %c1_i32 = arith.constant 1 : i32
    %46 = arith.index_cast %c1_i32 : i32 to index
    %c0_14 = arith.constant 0 : index
    %c0_15 = arith.constant 0 : index
    %47 = vector.load %arg0[%46, %c0_14, %c0_15] : memref<8x8x256xf32, #tpu.memory_space<vmem>>, vector<1x8x256xf32>
    %48 = vector.shape_cast %47 : vector<1x8x256xf32> to vector<8x256xf32>
    %c0_16 = arith.constant 0 : index
    %c0_17 = arith.constant 0 : index
    %49 = vector.load %arg1[%c0_16, %c0_17] : memref<64x256xf32, #tpu.memory_space<vmem>>, vector<64x256xf32>
    %cst_18 = arith.constant dense<0.000000e+00> : vector<8x256xf32>
    %50 = tpu.matmul %44, %49, %cst_18 {dimension_numbers = #tpu.dot_dimension_numbers<[1], [0], [0], [1], [0, 0, 1, 1], [], []>} : vector<8x64xf32>, vector<64x256xf32>, vector<8x256xf32> -> vector<8x256xf32>
    %51 = arith.addf %48, %50 : vector<8x256xf32>
    %52 = vector.extract_strided_slice %51 {offsets = [0, 0], sizes = [8, 64], strides = [1, 1]} : vector<8x256xf32> to vector<8x64xf32>
    %53 = arith.negf %52 : vector<8x64xf32>
    %54 = math.exp %53 : vector<8x64xf32>
    %cst_19 = arith.constant 1.000000e+00 : f32
    %55 = vector.broadcast %cst_19 : f32 to vector<8x64xf32>
    %56 = arith.addf %55, %54 : vector<8x64xf32>
    %57 = arith.divf %55, %56 : vector<8x64xf32>
    %58 = vector.extract_strided_slice %51 {offsets = [0, 64], sizes = [8, 64], strides = [1, 1]} : vector<8x256xf32> to vector<8x64xf32>
    %59 = arith.negf %58 : vector<8x64xf32>
    %60 = math.exp %59 : vector<8x64xf32>
    %cst_20 = arith.constant 1.000000e+00 : f32
    %61 = vector.broadcast %cst_20 : f32 to vector<8x64xf32>
    %62 = arith.addf %61, %60 : vector<8x64xf32>
    %63 = arith.divf %61, %62 : vector<8x64xf32>
    %64 = vector.extract_strided_slice %51 {offsets = [0, 128], sizes = [8, 64], strides = [1, 1]} : vector<8x256xf32> to vector<8x64xf32>
    %65 = math.tanh %64 : vector<8x64xf32>
    %66 = vector.extract_strided_slice %51 {offsets = [0, 192], sizes = [8, 64], strides = [1, 1]} : vector<8x256xf32> to vector<8x64xf32>
    %67 = arith.negf %66 : vector<8x64xf32>
    %68 = math.exp %67 : vector<8x64xf32>
    %cst_21 = arith.constant 1.000000e+00 : f32
    %69 = vector.broadcast %cst_21 : f32 to vector<8x64xf32>
    %70 = arith.addf %69, %68 : vector<8x64xf32>
    %71 = arith.divf %69, %70 : vector<8x64xf32>
    %72 = arith.mulf %63, %45 : vector<8x64xf32>
    %73 = arith.mulf %57, %65 : vector<8x64xf32>
    %74 = arith.addf %72, %73 : vector<8x64xf32>
    %75 = math.tanh %74 : vector<8x64xf32>
    %76 = arith.mulf %71, %75 : vector<8x64xf32>
    %77 = arith.index_cast %c1_i32 : i32 to index
    %c0_22 = arith.constant 0 : index
    %c0_23 = arith.constant 0 : index
    %78 = vector.load %arg2[%77, %c0_22, %c0_23] : memref<8x8x64xf32, #tpu.memory_space<vmem>>, vector<1x8x64xf32>
    %79 = vector.shape_cast %78 : vector<1x8x64xf32> to vector<8x64xf32>
    %cst_24 = arith.constant 0.000000e+00 : f32
    %80 = vector.broadcast %cst_24 : f32 to vector<8x64xf32>
    %81 = arith.cmpf one, %79, %80 : vector<8x64xf32>
    %cst_25 = arith.constant 0.000000e+00 : f32
    %82 = vector.broadcast %cst_25 : f32 to vector<8x64xf32>
    %83 = arith.select %81, %76, %82 : vector<8x64xi1>, vector<8x64xf32>
    %84 = arith.index_cast %c1_i32 : i32 to index
    %c0_26 = arith.constant 0 : index
    %c0_27 = arith.constant 0 : index
    %85 = vector.load %arg3[%84, %c0_26, %c0_27] : memref<8x8x64xf32, #tpu.memory_space<vmem>>, vector<1x8x64xf32>
    %86 = vector.shape_cast %85 : vector<1x8x64xf32> to vector<8x64xf32>
    %87 = vector.shape_cast %83 : vector<8x64xf32> to vector<1x8x64xf32>
    tpu.vector_store %arg3[%84, %c0_26, %c0_27], %87 {strides = array<i32>} : memref<8x8x64xf32, #tpu.memory_space<vmem>>, vector<1x8x64xf32>,
    %88 = arith.select %81, %76, %44 : vector<8x64xi1>, vector<8x64xf32>
    %89 = arith.select %81, %74, %45 : vector<8x64xi1>, vector<8x64xf32>
    %c2_i32 = arith.constant 2 : i32
    %90 = arith.index_cast %c2_i32 : i32 to index
    %c0_28 = arith.constant 0 : index
    %c0_29 = arith.constant 0 : index
    %91 = vector.load %arg0[%90, %c0_28, %c0_29] : memref<8x8x256xf32, #tpu.memory_space<vmem>>, vector<1x8x256xf32>
    %92 = vector.shape_cast %91 : vector<1x8x256xf32> to vector<8x256xf32>
    %c0_30 = arith.constant 0 : index
    %c0_31 = arith.constant 0 : index
    %93 = vector.load %arg1[%c0_30, %c0_31] : memref<64x256xf32, #tpu.memory_space<vmem>>, vector<64x256xf32>
    %cst_32 = arith.constant dense<0.000000e+00> : vector<8x256xf32>
    %94 = tpu.matmul %88, %93, %cst_32 {dimension_numbers = #tpu.dot_dimension_numbers<[1], [0], [0], [1], [0, 0, 1, 1], [], []>} : vector<8x64xf32>, vector<64x256xf32>, vector<8x256xf32> -> vector<8x256xf32>
    %95 = arith.addf %92, %94 : vector<8x256xf32>
    %96 = vector.extract_strided_slice %95 {offsets = [0, 0], sizes = [8, 64], strides = [1, 1]} : vector<8x256xf32> to vector<8x64xf32>
    %97 = arith.negf %96 : vector<8x64xf32>
    %98 = math.exp %97 : vector<8x64xf32>
    %cst_33 = arith.constant 1.000000e+00 : f32
    %99 = vector.broadcast %cst_33 : f32 to vector<8x64xf32>
    %100 = arith.addf %99, %98 : vector<8x64xf32>
    %101 = arith.divf %99, %100 : vector<8x64xf32>
    %102 = vector.extract_strided_slice %95 {offsets = [0, 64], sizes = [8, 64], strides = [1, 1]} : vector<8x256xf32> to vector<8x64xf32>
    %103 = arith.negf %102 : vector<8x64xf32>
    %104 = math.exp %103 : vector<8x64xf32>
    %cst_34 = arith.constant 1.000000e+00 : f32
    %105 = vector.broadcast %cst_34 : f32 to vector<8x64xf32>
    %106 = arith.addf %105, %104 : vector<8x64xf32>
    %107 = arith.divf %105, %106 : vector<8x64xf32>
    %108 = vector.extract_strided_slice %95 {offsets = [0, 128], sizes = [8, 64], strides = [1, 1]} : vector<8x256xf32> to vector<8x64xf32>
    %109 = math.tanh %108 : vector<8x64xf32>
    %110 = vector.extract_strided_slice %95 {offsets = [0, 192], sizes = [8, 64], strides = [1, 1]} : vector<8x256xf32> to vector<8x64xf32>
    %111 = arith.negf %110 : vector<8x64xf32>
    %112 = math.exp %111 : vector<8x64xf32>
    %cst_35 = arith.constant 1.000000e+00 : f32
    %113 = vector.broadcast %cst_35 : f32 to vector<8x64xf32>
    %114 = arith.addf %113, %112 : vector<8x64xf32>
    %115 = arith.divf %113, %114 : vector<8x64xf32>
    %116 = arith.mulf %107, %89 : vector<8x64xf32>
    %117 = arith.mulf %101, %109 : vector<8x64xf32>
    %118 = arith.addf %116, %117 : vector<8x64xf32>
    %119 = math.tanh %118 : vector<8x64xf32>
    %120 = arith.mulf %115, %119 : vector<8x64xf32>
    %121 = arith.index_cast %c2_i32 : i32 to index
    %c0_36 = arith.constant 0 : index
    %c0_37 = arith.constant 0 : index
    %122 = vector.load %arg2[%121, %c0_36, %c0_37] : memref<8x8x64xf32, #tpu.memory_space<vmem>>, vector<1x8x64xf32>
    %123 = vector.shape_cast %122 : vector<1x8x64xf32> to vector<8x64xf32>
    %cst_38 = arith.constant 0.000000e+00 : f32
    %124 = vector.broadcast %cst_38 : f32 to vector<8x64xf32>
    %125 = arith.cmpf one, %123, %124 : vector<8x64xf32>
    %cst_39 = arith.constant 0.000000e+00 : f32
    %126 = vector.broadcast %cst_39 : f32 to vector<8x64xf32>
    %127 = arith.select %125, %120, %126 : vector<8x64xi1>, vector<8x64xf32>
    %128 = arith.index_cast %c2_i32 : i32 to index
    %c0_40 = arith.constant 0 : index
    %c0_41 = arith.constant 0 : index
    %129 = vector.load %arg3[%128, %c0_40, %c0_41] : memref<8x8x64xf32, #tpu.memory_space<vmem>>, vector<1x8x64xf32>
    %130 = vector.shape_cast %129 : vector<1x8x64xf32> to vector<8x64xf32>
    %131 = vector.shape_cast %127 : vector<8x64xf32> to vector<1x8x64xf32>
    tpu.vector_store %arg3[%128, %c0_40, %c0_41], %131 {strides = array<i32>} : memref<8x8x64xf32, #tpu.memory_space<vmem>>, vector<1x8x64xf32>,
    %132 = arith.select %125, %120, %88 : vector<8x64xi1>, vector<8x64xf32>
    %133 = arith.select %125, %118, %89 : vector<8x64xi1>, vector<8x64xf32>
    %c3_i32 = arith.constant 3 : i32
    %134 = arith.index_cast %c3_i32 : i32 to index
    %c0_42 = arith.constant 0 : index
    %c0_43 = arith.constant 0 : index
    %135 = vector.load %arg0[%134, %c0_42, %c0_43] : memref<8x8x256xf32, #tpu.memory_space<vmem>>, vector<1x8x256xf32>
    %136 = vector.shape_cast %135 : vector<1x8x256xf32> to vector<8x256xf32>
    %c0_44 = arith.constant 0 : index
    %c0_45 = arith.constant 0 : index
    %137 = vector.load %arg1[%c0_44, %c0_45] : memref<64x256xf32, #tpu.memory_space<vmem>>, vector<64x256xf32>
    %cst_46 = arith.constant dense<0.000000e+00> : vector<8x256xf32>
    %138 = tpu.matmul %132, %137, %cst_46 {dimension_numbers = #tpu.dot_dimension_numbers<[1], [0], [0], [1], [0, 0, 1, 1], [], []>} : vector<8x64xf32>, vector<64x256xf32>, vector<8x256xf32> -> vector<8x256xf32>
    %139 = arith.addf %136, %138 : vector<8x256xf32>
    %140 = vector.extract_strided_slice %139 {offsets = [0, 0], sizes = [8, 64], strides = [1, 1]} : vector<8x256xf32> to vector<8x64xf32>
    %141 = arith.negf %140 : vector<8x64xf32>
    %142 = math.exp %141 : vector<8x64xf32>
    %cst_47 = arith.constant 1.000000e+00 : f32
    %143 = vector.broadcast %cst_47 : f32 to vector<8x64xf32>
    %144 = arith.addf %143, %142 : vector<8x64xf32>
    %145 = arith.divf %143, %144 : vector<8x64xf32>
    %146 = vector.extract_strided_slice %139 {offsets = [0, 64], sizes = [8, 64], strides = [1, 1]} : vector<8x256xf32> to vector<8x64xf32>
    %147 = arith.negf %146 : vector<8x64xf32>
    %148 = math.exp %147 : vector<8x64xf32>
    %cst_48 = arith.constant 1.000000e+00 : f32
    %149 = vector.broadcast %cst_48 : f32 to vector<8x64xf32>
    %150 = arith.addf %149, %148 : vector<8x64xf32>
    %151 = arith.divf %149, %150 : vector<8x64xf32>
    %152 = vector.extract_strided_slice %139 {offsets = [0, 128], sizes = [8, 64], strides = [1, 1]} : vector<8x256xf32> to vector<8x64xf32>
    %153 = math.tanh %152 : vector<8x64xf32>
    %154 = vector.extract_strided_slice %139 {offsets = [0, 192], sizes = [8, 64], strides = [1, 1]} : vector<8x256xf32> to vector<8x64xf32>
    %155 = arith.negf %154 : vector<8x64xf32>
    %156 = math.exp %155 : vector<8x64xf32>
    %cst_49 = arith.constant 1.000000e+00 : f32
    %157 = vector.broadcast %cst_49 : f32 to vector<8x64xf32>
    %158 = arith.addf %157, %156 : vector<8x64xf32>
    %159 = arith.divf %157, %158 : vector<8x64xf32>
    %160 = arith.mulf %151, %133 : vector<8x64xf32>
    %161 = arith.mulf %145, %153 : vector<8x64xf32>
    %162 = arith.addf %160, %161 : vector<8x64xf32>
    %163 = math.tanh %162 : vector<8x64xf32>
    %164 = arith.mulf %159, %163 : vector<8x64xf32>
    %165 = arith.index_cast %c3_i32 : i32 to index
    %c0_50 = arith.constant 0 : index
    %c0_51 = arith.constant 0 : index
    %166 = vector.load %arg2[%165, %c0_50, %c0_51] : memref<8x8x64xf32, #tpu.memory_space<vmem>>, vector<1x8x64xf32>
    %167 = vector.shape_cast %166 : vector<1x8x64xf32> to vector<8x64xf32>
    %cst_52 = arith.constant 0.000000e+00 : f32
    %168 = vector.broadcast %cst_52 : f32 to vector<8x64xf32>
    %169 = arith.cmpf one, %167, %168 : vector<8x64xf32>
    %cst_53 = arith.constant 0.000000e+00 : f32
    %170 = vector.broadcast %cst_53 : f32 to vector<8x64xf32>
    %171 = arith.select %169, %164, %170 : vector<8x64xi1>, vector<8x64xf32>
    %172 = arith.index_cast %c3_i32 : i32 to index
    %c0_54 = arith.constant 0 : index
    %c0_55 = arith.constant 0 : index
    %173 = vector.load %arg3[%172, %c0_54, %c0_55] : memref<8x8x64xf32, #tpu.memory_space<vmem>>, vector<1x8x64xf32>
    %174 = vector.shape_cast %173 : vector<1x8x64xf32> to vector<8x64xf32>
    %175 = vector.shape_cast %171 : vector<8x64xf32> to vector<1x8x64xf32>
    tpu.vector_store %arg3[%172, %c0_54, %c0_55], %175 {strides = array<i32>} : memref<8x8x64xf32, #tpu.memory_space<vmem>>, vector<1x8x64xf32>,
    %176 = arith.select %169, %164, %132 : vector<8x64xi1>, vector<8x64xf32>
    %177 = arith.select %169, %162, %133 : vector<8x64xi1>, vector<8x64xf32>
    %c4_i32 = arith.constant 4 : i32
    %178 = arith.index_cast %c4_i32 : i32 to index
    %c0_56 = arith.constant 0 : index
    %c0_57 = arith.constant 0 : index
    %179 = vector.load %arg0[%178, %c0_56, %c0_57] : memref<8x8x256xf32, #tpu.memory_space<vmem>>, vector<1x8x256xf32>
    %180 = vector.shape_cast %179 : vector<1x8x256xf32> to vector<8x256xf32>
    %c0_58 = arith.constant 0 : index
    %c0_59 = arith.constant 0 : index
    %181 = vector.load %arg1[%c0_58, %c0_59] : memref<64x256xf32, #tpu.memory_space<vmem>>, vector<64x256xf32>
    %cst_60 = arith.constant dense<0.000000e+00> : vector<8x256xf32>
    %182 = tpu.matmul %176, %181, %cst_60 {dimension_numbers = #tpu.dot_dimension_numbers<[1], [0], [0], [1], [0, 0, 1, 1], [], []>} : vector<8x64xf32>, vector<64x256xf32>, vector<8x256xf32> -> vector<8x256xf32>
    %183 = arith.addf %180, %182 : vector<8x256xf32>
    %184 = vector.extract_strided_slice %183 {offsets = [0, 0], sizes = [8, 64], strides = [1, 1]} : vector<8x256xf32> to vector<8x64xf32>
    %185 = arith.negf %184 : vector<8x64xf32>
    %186 = math.exp %185 : vector<8x64xf32>
    %cst_61 = arith.constant 1.000000e+00 : f32
    %187 = vector.broadcast %cst_61 : f32 to vector<8x64xf32>
    %188 = arith.addf %187, %186 : vector<8x64xf32>
    %189 = arith.divf %187, %188 : vector<8x64xf32>
    %190 = vector.extract_strided_slice %183 {offsets = [0, 64], sizes = [8, 64], strides = [1, 1]} : vector<8x256xf32> to vector<8x64xf32>
    %191 = arith.negf %190 : vector<8x64xf32>
    %192 = math.exp %191 : vector<8x64xf32>
    %cst_62 = arith.constant 1.000000e+00 : f32
    %193 = vector.broadcast %cst_62 : f32 to vector<8x64xf32>
    %194 = arith.addf %193, %192 : vector<8x64xf32>
    %195 = arith.divf %193, %194 : vector<8x64xf32>
    %196 = vector.extract_strided_slice %183 {offsets = [0, 128], sizes = [8, 64], strides = [1, 1]} : vector<8x256xf32> to vector<8x64xf32>
    %197 = math.tanh %196 : vector<8x64xf32>
    %198 = vector.extract_strided_slice %183 {offsets = [0, 192], sizes = [8, 64], strides = [1, 1]} : vector<8x256xf32> to vector<8x64xf32>
    %199 = arith.negf %198 : vector<8x64xf32>
    %200 = math.exp %199 : vector<8x64xf32>
    %cst_63 = arith.constant 1.000000e+00 : f32
    %201 = vector.broadcast %cst_63 : f32 to vector<8x64xf32>
    %202 = arith.addf %201, %200 : vector<8x64xf32>
    %203 = arith.divf %201, %202 : vector<8x64xf32>
    %204 = arith.mulf %195, %177 : vector<8x64xf32>
    %205 = arith.mulf %189, %197 : vector<8x64xf32>
    %206 = arith.addf %204, %205 : vector<8x64xf32>
    %207 = math.tanh %206 : vector<8x64xf32>
    %208 = arith.mulf %203, %207 : vector<8x64xf32>
    %209 = arith.index_cast %c4_i32 : i32 to index
    %c0_64 = arith.constant 0 : index
    %c0_65 = arith.constant 0 : index
    %210 = vector.load %arg2[%209, %c0_64, %c0_65] : memref<8x8x64xf32, #tpu.memory_space<vmem>>, vector<1x8x64xf32>
    %211 = vector.shape_cast %210 : vector<1x8x64xf32> to vector<8x64xf32>
    %cst_66 = arith.constant 0.000000e+00 : f32
    %212 = vector.broadcast %cst_66 : f32 to vector<8x64xf32>
    %213 = arith.cmpf one, %211, %212 : vector<8x64xf32>
    %cst_67 = arith.constant 0.000000e+00 : f32
    %214 = vector.broadcast %cst_67 : f32 to vector<8x64xf32>
    %215 = arith.select %213, %208, %214 : vector<8x64xi1>, vector<8x64xf32>
    %216 = arith.index_cast %c4_i32 : i32 to index
    %c0_68 = arith.constant 0 : index
    %c0_69 = arith.constant 0 : index
    %217 = vector.load %arg3[%216, %c0_68, %c0_69] : memref<8x8x64xf32, #tpu.memory_space<vmem>>, vector<1x8x64xf32>
    %218 = vector.shape_cast %217 : vector<1x8x64xf32> to vector<8x64xf32>
    %219 = vector.shape_cast %215 : vector<8x64xf32> to vector<1x8x64xf32>
    tpu.vector_store %arg3[%216, %c0_68, %c0_69], %219 {strides = array<i32>} : memref<8x8x64xf32, #tpu.memory_space<vmem>>, vector<1x8x64xf32>,
    %220 = arith.select %213, %208, %176 : vector<8x64xi1>, vector<8x64xf32>
    %221 = arith.select %213, %206, %177 : vector<8x64xi1>, vector<8x64xf32>
    %c5_i32 = arith.constant 5 : i32
    %222 = arith.index_cast %c5_i32 : i32 to index
    %c0_70 = arith.constant 0 : index
    %c0_71 = arith.constant 0 : index
    %223 = vector.load %arg0[%222, %c0_70, %c0_71] : memref<8x8x256xf32, #tpu.memory_space<vmem>>, vector<1x8x256xf32>
    %224 = vector.shape_cast %223 : vector<1x8x256xf32> to vector<8x256xf32>
    %c0_72 = arith.constant 0 : index
    %c0_73 = arith.constant 0 : index
    %225 = vector.load %arg1[%c0_72, %c0_73] : memref<64x256xf32, #tpu.memory_space<vmem>>, vector<64x256xf32>
    %cst_74 = arith.constant dense<0.000000e+00> : vector<8x256xf32>
    %226 = tpu.matmul %220, %225, %cst_74 {dimension_numbers = #tpu.dot_dimension_numbers<[1], [0], [0], [1], [0, 0, 1, 1], [], []>} : vector<8x64xf32>, vector<64x256xf32>, vector<8x256xf32> -> vector<8x256xf32>
    %227 = arith.addf %224, %226 : vector<8x256xf32>
    %228 = vector.extract_strided_slice %227 {offsets = [0, 0], sizes = [8, 64], strides = [1, 1]} : vector<8x256xf32> to vector<8x64xf32>
    %229 = arith.negf %228 : vector<8x64xf32>
    %230 = math.exp %229 : vector<8x64xf32>
    %cst_75 = arith.constant 1.000000e+00 : f32
    %231 = vector.broadcast %cst_75 : f32 to vector<8x64xf32>
    %232 = arith.addf %231, %230 : vector<8x64xf32>
    %233 = arith.divf %231, %232 : vector<8x64xf32>
    %234 = vector.extract_strided_slice %227 {offsets = [0, 64], sizes = [8, 64], strides = [1, 1]} : vector<8x256xf32> to vector<8x64xf32>
    %235 = arith.negf %234 : vector<8x64xf32>
    %236 = math.exp %235 : vector<8x64xf32>
    %cst_76 = arith.constant 1.000000e+00 : f32
    %237 = vector.broadcast %cst_76 : f32 to vector<8x64xf32>
    %238 = arith.addf %237, %236 : vector<8x64xf32>
    %239 = arith.divf %237, %238 : vector<8x64xf32>
    %240 = vector.extract_strided_slice %227 {offsets = [0, 128], sizes = [8, 64], strides = [1, 1]} : vector<8x256xf32> to vector<8x64xf32>
    %241 = math.tanh %240 : vector<8x64xf32>
    %242 = vector.extract_strided_slice %227 {offsets = [0, 192], sizes = [8, 64], strides = [1, 1]} : vector<8x256xf32> to vector<8x64xf32>
    %243 = arith.negf %242 : vector<8x64xf32>
    %244 = math.exp %243 : vector<8x64xf32>
    %cst_77 = arith.constant 1.000000e+00 : f32
    %245 = vector.broadcast %cst_77 : f32 to vector<8x64xf32>
    %246 = arith.addf %245, %244 : vector<8x64xf32>
    %247 = arith.divf %245, %246 : vector<8x64xf32>
    %248 = arith.mulf %239, %221 : vector<8x64xf32>
    %249 = arith.mulf %233, %241 : vector<8x64xf32>
    %250 = arith.addf %248, %249 : vector<8x64xf32>
    %251 = math.tanh %250 : vector<8x64xf32>
    %252 = arith.mulf %247, %251 : vector<8x64xf32>
    %253 = arith.index_cast %c5_i32 : i32 to index
    %c0_78 = arith.constant 0 : index
    %c0_79 = arith.constant 0 : index
    %254 = vector.load %arg2[%253, %c0_78, %c0_79] : memref<8x8x64xf32, #tpu.memory_space<vmem>>, vector<1x8x64xf32>
    %255 = vector.shape_cast %254 : vector<1x8x64xf32> to vector<8x64xf32>
    %cst_80 = arith.constant 0.000000e+00 : f32
    %256 = vector.broadcast %cst_80 : f32 to vector<8x64xf32>
    %257 = arith.cmpf one, %255, %256 : vector<8x64xf32>
    %cst_81 = arith.constant 0.000000e+00 : f32
    %258 = vector.broadcast %cst_81 : f32 to vector<8x64xf32>
    %259 = arith.select %257, %252, %258 : vector<8x64xi1>, vector<8x64xf32>
    %260 = arith.index_cast %c5_i32 : i32 to index
    %c0_82 = arith.constant 0 : index
    %c0_83 = arith.constant 0 : index
    %261 = vector.load %arg3[%260, %c0_82, %c0_83] : memref<8x8x64xf32, #tpu.memory_space<vmem>>, vector<1x8x64xf32>
    %262 = vector.shape_cast %261 : vector<1x8x64xf32> to vector<8x64xf32>
    %263 = vector.shape_cast %259 : vector<8x64xf32> to vector<1x8x64xf32>
    tpu.vector_store %arg3[%260, %c0_82, %c0_83], %263 {strides = array<i32>} : memref<8x8x64xf32, #tpu.memory_space<vmem>>, vector<1x8x64xf32>,
    %264 = arith.select %257, %252, %220 : vector<8x64xi1>, vector<8x64xf32>
    %265 = arith.select %257, %250, %221 : vector<8x64xi1>, vector<8x64xf32>
    %c6_i32 = arith.constant 6 : i32
    %266 = arith.index_cast %c6_i32 : i32 to index
    %c0_84 = arith.constant 0 : index
    %c0_85 = arith.constant 0 : index
    %267 = vector.load %arg0[%266, %c0_84, %c0_85] : memref<8x8x256xf32, #tpu.memory_space<vmem>>, vector<1x8x256xf32>
    %268 = vector.shape_cast %267 : vector<1x8x256xf32> to vector<8x256xf32>
    %c0_86 = arith.constant 0 : index
    %c0_87 = arith.constant 0 : index
    %269 = vector.load %arg1[%c0_86, %c0_87] : memref<64x256xf32, #tpu.memory_space<vmem>>, vector<64x256xf32>
    %cst_88 = arith.constant dense<0.000000e+00> : vector<8x256xf32>
    %270 = tpu.matmul %264, %269, %cst_88 {dimension_numbers = #tpu.dot_dimension_numbers<[1], [0], [0], [1], [0, 0, 1, 1], [], []>} : vector<8x64xf32>, vector<64x256xf32>, vector<8x256xf32> -> vector<8x256xf32>
    %271 = arith.addf %268, %270 : vector<8x256xf32>
    %272 = vector.extract_strided_slice %271 {offsets = [0, 0], sizes = [8, 64], strides = [1, 1]} : vector<8x256xf32> to vector<8x64xf32>
    %273 = arith.negf %272 : vector<8x64xf32>
    %274 = math.exp %273 : vector<8x64xf32>
    %cst_89 = arith.constant 1.000000e+00 : f32
    %275 = vector.broadcast %cst_89 : f32 to vector<8x64xf32>
    %276 = arith.addf %275, %274 : vector<8x64xf32>
    %277 = arith.divf %275, %276 : vector<8x64xf32>
    %278 = vector.extract_strided_slice %271 {offsets = [0, 64], sizes = [8, 64], strides = [1, 1]} : vector<8x256xf32> to vector<8x64xf32>
    %279 = arith.negf %278 : vector<8x64xf32>
    %280 = math.exp %279 : vector<8x64xf32>
    %cst_90 = arith.constant 1.000000e+00 : f32
    %281 = vector.broadcast %cst_90 : f32 to vector<8x64xf32>
    %282 = arith.addf %281, %280 : vector<8x64xf32>
    %283 = arith.divf %281, %282 : vector<8x64xf32>
    %284 = vector.extract_strided_slice %271 {offsets = [0, 128], sizes = [8, 64], strides = [1, 1]} : vector<8x256xf32> to vector<8x64xf32>
    %285 = math.tanh %284 : vector<8x64xf32>
    %286 = vector.extract_strided_slice %271 {offsets = [0, 192], sizes = [8, 64], strides = [1, 1]} : vector<8x256xf32> to vector<8x64xf32>
    %287 = arith.negf %286 : vector<8x64xf32>
    %288 = math.exp %287 : vector<8x64xf32>
    %cst_91 = arith.constant 1.000000e+00 : f32
    %289 = vector.broadcast %cst_91 : f32 to vector<8x64xf32>
    %290 = arith.addf %289, %288 : vector<8x64xf32>
    %291 = arith.divf %289, %290 : vector<8x64xf32>
    %292 = arith.mulf %283, %265 : vector<8x64xf32>
    %293 = arith.mulf %277, %285 : vector<8x64xf32>
    %294 = arith.addf %292, %293 : vector<8x64xf32>
    %295 = math.tanh %294 : vector<8x64xf32>
    %296 = arith.mulf %291, %295 : vector<8x64xf32>
    %297 = arith.index_cast %c6_i32 : i32 to index
    %c0_92 = arith.constant 0 : index
    %c0_93 = arith.constant 0 : index
    %298 = vector.load %arg2[%297, %c0_92, %c0_93] : memref<8x8x64xf32, #tpu.memory_space<vmem>>, vector<1x8x64xf32>
    %299 = vector.shape_cast %298 : vector<1x8x64xf32> to vector<8x64xf32>
    %cst_94 = arith.constant 0.000000e+00 : f32
    %300 = vector.broadcast %cst_94 : f32 to vector<8x64xf32>
    %301 = arith.cmpf one, %299, %300 : vector<8x64xf32>
    %cst_95 = arith.constant 0.000000e+00 : f32
    %302 = vector.broadcast %cst_95 : f32 to vector<8x64xf32>
    %303 = arith.select %301, %296, %302 : vector<8x64xi1>, vector<8x64xf32>
    %304 = arith.index_cast %c6_i32 : i32 to index
    %c0_96 = arith.constant 0 : index
    %c0_97 = arith.constant 0 : index
    %305 = vector.load %arg3[%304, %c0_96, %c0_97] : memref<8x8x64xf32, #tpu.memory_space<vmem>>, vector<1x8x64xf32>
    %306 = vector.shape_cast %305 : vector<1x8x64xf32> to vector<8x64xf32>
    %307 = vector.shape_cast %303 : vector<8x64xf32> to vector<1x8x64xf32>
    tpu.vector_store %arg3[%304, %c0_96, %c0_97], %307 {strides = array<i32>} : memref<8x8x64xf32, #tpu.memory_space<vmem>>, vector<1x8x64xf32>,
    %308 = arith.select %301, %296, %264 : vector<8x64xi1>, vector<8x64xf32>
    %309 = arith.select %301, %294, %265 : vector<8x64xi1>, vector<8x64xf32>
    %c7_i32 = arith.constant 7 : i32
    %310 = arith.index_cast %c7_i32 : i32 to index
    %c0_98 = arith.constant 0 : index
    %c0_99 = arith.constant 0 : index
    %311 = vector.load %arg0[%310, %c0_98, %c0_99] : memref<8x8x256xf32, #tpu.memory_space<vmem>>, vector<1x8x256xf32>
    %312 = vector.shape_cast %311 : vector<1x8x256xf32> to vector<8x256xf32>
    %c0_100 = arith.constant 0 : index
    %c0_101 = arith.constant 0 : index
    %313 = vector.load %arg1[%c0_100, %c0_101] : memref<64x256xf32, #tpu.memory_space<vmem>>, vector<64x256xf32>
    %cst_102 = arith.constant dense<0.000000e+00> : vector<8x256xf32>
    %314 = tpu.matmul %308, %313, %cst_102 {dimension_numbers = #tpu.dot_dimension_numbers<[1], [0], [0], [1], [0, 0, 1, 1], [], []>} : vector<8x64xf32>, vector<64x256xf32>, vector<8x256xf32> -> vector<8x256xf32>
    %315 = arith.addf %312, %314 : vector<8x256xf32>
    %316 = vector.extract_strided_slice %315 {offsets = [0, 0], sizes = [8, 64], strides = [1, 1]} : vector<8x256xf32> to vector<8x64xf32>
    %317 = arith.negf %316 : vector<8x64xf32>
    %318 = math.exp %317 : vector<8x64xf32>
    %cst_103 = arith.constant 1.000000e+00 : f32
    %319 = vector.broadcast %cst_103 : f32 to vector<8x64xf32>
    %320 = arith.addf %319, %318 : vector<8x64xf32>
    %321 = arith.divf %319, %320 : vector<8x64xf32>
    %322 = vector.extract_strided_slice %315 {offsets = [0, 64], sizes = [8, 64], strides = [1, 1]} : vector<8x256xf32> to vector<8x64xf32>
    %323 = arith.negf %322 : vector<8x64xf32>
    %324 = math.exp %323 : vector<8x64xf32>
    %cst_104 = arith.constant 1.000000e+00 : f32
    %325 = vector.broadcast %cst_104 : f32 to vector<8x64xf32>
    %326 = arith.addf %325, %324 : vector<8x64xf32>
    %327 = arith.divf %325, %326 : vector<8x64xf32>
    %328 = vector.extract_strided_slice %315 {offsets = [0, 128], sizes = [8, 64], strides = [1, 1]} : vector<8x256xf32> to vector<8x64xf32>
    %329 = math.tanh %328 : vector<8x64xf32>
    %330 = vector.extract_strided_slice %315 {offsets = [0, 192], sizes = [8, 64], strides = [1, 1]} : vector<8x256xf32> to vector<8x64xf32>
    %331 = arith.negf %330 : vector<8x64xf32>
    %332 = math.exp %331 : vector<8x64xf32>
    %cst_105 = arith.constant 1.000000e+00 : f32
    %333 = vector.broadcast %cst_105 : f32 to vector<8x64xf32>
    %334 = arith.addf %333, %332 : vector<8x64xf32>
    %335 = arith.divf %333, %334 : vector<8x64xf32>
    %336 = arith.mulf %327, %309 : vector<8x64xf32>
    %337 = arith.mulf %321, %329 : vector<8x64xf32>
    %338 = arith.addf %336, %337 : vector<8x64xf32>
    %339 = math.tanh %338 : vector<8x64xf32>
    %340 = arith.mulf %335, %339 : vector<8x64xf32>
    %341 = arith.index_cast %c7_i32 : i32 to index
    %c0_106 = arith.constant 0 : index
    %c0_107 = arith.constant 0 : index
    %342 = vector.load %arg2[%341, %c0_106, %c0_107] : memref<8x8x64xf32, #tpu.memory_space<vmem>>, vector<1x8x64xf32>
    %343 = vector.shape_cast %342 : vector<1x8x64xf32> to vector<8x64xf32>
    %cst_108 = arith.constant 0.000000e+00 : f32
    %344 = vector.broadcast %cst_108 : f32 to vector<8x64xf32>
    %345 = arith.cmpf one, %343, %344 : vector<8x64xf32>
    %cst_109 = arith.constant 0.000000e+00 : f32
    %346 = vector.broadcast %cst_109 : f32 to vector<8x64xf32>
    %347 = arith.select %345, %340, %346 : vector<8x64xi1>, vector<8x64xf32>
    %348 = arith.index_cast %c7_i32 : i32 to index
    %c0_110 = arith.constant 0 : index
    %c0_111 = arith.constant 0 : index
    %349 = vector.load %arg3[%348, %c0_110, %c0_111] : memref<8x8x64xf32, #tpu.memory_space<vmem>>, vector<1x8x64xf32>
    %350 = vector.shape_cast %349 : vector<1x8x64xf32> to vector<8x64xf32>
    %351 = vector.shape_cast %347 : vector<8x64xf32> to vector<1x8x64xf32>
    tpu.vector_store %arg3[%348, %c0_110, %c0_111], %351 {strides = array<i32>} : memref<8x8x64xf32, #tpu.memory_space<vmem>>, vector<1x8x64xf32>,
    %352 = arith.select %345, %340, %308 : vector<8x64xi1>, vector<8x64xf32>
    %353 = arith.select %345, %338, %309 : vector<8x64xi1>, vector<8x64xf32>
    %c8_i32 = arith.constant 8 : i32
    return
  }
}

</mosaic_0001>

<bundles_post_ra>
// kernel: tpu_custom_call.1
= control target key start
LH: loop header
LB: loop body
LE: loop exit
PB: predicated region body
PF: predicated region fallthrough
CT: control target
= control target key end

     0   :  { %8 = vsyncpa [#allocation3], 0  ;;  %s1634_s0 = inlined_call_operand.hbm [shape: f32[8,8,256], index: 0, kind: input, shape index: {}]   ;;  %s1635_s1 = inlined_call_operand.hbm [shape: f32[64,256], index: 1, kind: input, shape index: {}]   ;;  %s1636_s2 = inlined_call_operand.hbm [shape: f32[8,8,64], index: 2, kind: input, shape index: {}]   ;;  %s1637_s3 = inlined_call_operand.hbm [shape: f32[8,8,64], index: 3, kind: output, shape index: {}]  }
   0x1   :  { %9 = vsyncpa [#allocation6], 0 }
   0x2   :  { %10 = vsyncpa [#allocation4], 0  ;;  %s1372_s12 = smov [#allocation5]   ;;  %s1373_s14 = smov [#allocation2]  }
   0x3   :  { %s28_s13 = sshll.u32 %s1372_s12, 4  ;;  %s16_s15 = sshll.u32 %s1373_s14, 4  ;;  %s29_s13 = int_to_ptr.vmem [resolvable:$true] %s28_s13  ;;  %s17_s15 = int_to_ptr.vmem [resolvable:$true] %s16_s15 }
   0x4   :  { %s1294_s16 = scalar_lea.vmem %s29_s13, 2048  ;;  %p1299_p1 = scmp.lt.s32.totalorder %s29_s13, %s29_s13 }
   0x5   :  { %p1295_p0 = scmp.ne.s32.totalorder %s29_s13, %s1294_s16  ;;  %p1300_p2 = scmp.lt.s32.totalorder %s1294_s16, %s1294_s16 }
   0x7   :  { %p1301_p3 = por %p1300_p2, %p1299_p1 }
   0x9   :  { %p1302_p4 = pnand %p1301_p3, %p1295_p0 }
   0xb   :  { %1305 = shalt.err (!%p1302_p4)
}
   0xc   :  { %s1374_s17 = smov 256   ;;  %s1375_s18 = smov 16  }
   0xd   :  { %34 = dma.hbm_to_vmem [thread:$0]  %s1635_s1, 2048, %s29_s13, [#allocation6], %s1374_s17, %s1374_s17, %s1375_s18  }
   0xe   :  { %s1314_s21 = scalar_lea.vmem %s17_s15, 2048  ;;  %p1319_p6 = scmp.lt.s32.totalorder %s17_s15, %s17_s15 }
   0xf   :  { %p1315_p5 = scmp.ne.s32.totalorder %s17_s15, %s1314_s21  ;;  %p1320_p7 = scmp.lt.s32.totalorder %s1314_s21, %s1314_s21 }
  0x11   :  { %p1321_p8 = por %p1320_p7, %p1319_p6 }
  0x13   :  { %p1322_p9 = pnand %p1321_p8, %p1315_p5 }
  0x15   :  { %1325 = shalt.err (!%p1322_p9)
}
  0x16   :  { %22 = dma.hbm_to_vmem [thread:$0]  %s1634_s0, 2048, %s17_s15, [#allocation3], %s1374_s17, %s1374_s17, %s1375_s18  }
  0x17   :  { %s1376_s24 = smov [#allocation7]  }
  0x18   :  { %s40_s25 = sshll.u32 %s1376_s24, 4  ;;  %s41_s25 = int_to_ptr.vmem [resolvable:$true] %s40_s25 }
  0x19   :  { %s1334_s26 = scalar_lea.vmem %s41_s25, 1024  ;;  %p1339_p11 = scmp.lt.s32.totalorder %s41_s25, %s41_s25 }
  0x1a   :  { %p1335_p10 = scmp.ne.s32.totalorder %s41_s25, %s1334_s26  ;;  %p1340_p12 = scmp.lt.s32.totalorder %s1334_s26, %s1334_s26 }
  0x1c   :  { %p1341_p13 = por %p1340_p12, %p1339_p11 }
  0x1e   :  { %p1342_p0 = pnand %p1341_p13, %p1335_p10 }
  0x20   :  { %1345 = shalt.err (!%p1342_p0)
}
  0x21   :  { %s1377_s1 = smov 128   ;;  %s1378_s27 = smov 8  }
  0x22   :  { %46 = dma.hbm_to_vmem [thread:$0]  %s1636_s2, 1024, %s41_s25, [#allocation6], %s1377_s1, %s1377_s1, %s1378_s27  }
  0x23   :  { %1366 = dma.done.wait [#allocation3], 2048  }
  0x24   :  { %1367 = vsyncadd [#allocation3], 4294965248 }
  0x25   :  { %1368 = dma.done.wait [#allocation6], 3072  }
  0x26   :  { %1369 = vsyncadd [#allocation6], 4294964224  ;;  %v1379_v0 = vmov 0.0   ;;  %v1416_v1 = vld [vmem:[#allocation5 + $0x78] sm:$0xff]  ;;  %v1418_v2 = vld [vmem:[#allocation5 + $0x70] sm:$0xff]  ;;  %s1380_s0 = smov 64  }
  0x27   :  { %142 = vmatprep.mubr.f32.mxu0 %v1379_v0  ;;  %272 = vmatprep.mubr.f32.mxu1 %v1379_v0  ;;  %v1420_v3 = vld [vmem:[#allocation5 + $0x68] sm:$0xff]  ;;  %v1423_v4 = vld [vmem:[#allocation5 + $0x60] sm:$0xff]  ;;  %v1427_v5 = vld [vmem:[#allocation5 + $0x58] sm:$0xff]  ;;  %vm74_vm1 = vcmask 523264   ;;  %s1381_s2 = smov [#allocation8]  }
  0x28   :  { %94 = vmatprep.subr.mxu0 %v1416_v1  ;;  %224 = vmatprep.subr.mxu1 %v1416_v1  ;;  %v1431_v6 = vld [vmem:[#allocation5 + $0x50] sm:$0xff]  ;;  %v1435_v7 = vld [vmem:[#allocation5 + $0x48] sm:$0xff]  ;;  %v1439_v8 = vld [vmem:[#allocation5 + $0x40] sm:$0xff]  ;;  %s1144_s30 = sshll.u32 %s1381_s2, 4  ;;  %s1145_s30 = int_to_ptr.vmem [resolvable:$true] %s1144_s30 }
  0x29   :  { %95 = vmatpush1.msra.mxu0 %v1418_v2  ;;  %225 = vmatpush1.msra.mxu1 %v1418_v2  ;;  %v1443_v9 = vld [vmem:[#allocation5 + $0x38] sm:$0xff]  ;;  %v1447_v10 = vld [vmem:[#allocation5 + $0x30] sm:$0xff]  ;;  %v1451_v11 = vld [vmem:[#allocation5 + $0x28] sm:$0xff]  ;;  %s1346_s4 = scalar_lea.vmem %s1145_s30, 1024  ;;  %p1351_p2 = scmp.lt.s32.totalorder %s1145_s30, %s1145_s30 }
  0x2a   :  { %96 = vmatprep.subr.mxu0 %v1420_v3  ;;  %226 = vmatprep.subr.mxu1 %v1420_v3  ;;  %v1455_v12 = vld [vmem:[#allocation5 + $0x20] sm:$0xff]  ;;  %v1459_v13 = vld [vmem:[#allocation5 + $0x18] sm:$0xff]  ;;  %v1463_v14 = vld [vmem:[#allocation5 + $0x10] sm:$0xff]  ;;  %p1347_p1 = scmp.ne.s32.totalorder %s1145_s30, %s1346_s4  ;;  %p1352_p3 = scmp.lt.s32.totalorder %s1346_s4, %s1346_s4 }
  0x2b   :  { %97 = vmatpush1.msra.mxu0 %v1423_v4  ;;  %227 = vmatpush1.msra.mxu1 %v1423_v4  ;;  %v1467_v15 = vld [vmem:[#allocation5 + $0x8] sm:$0xff]  ;;  %v1471_v16 = vld [vmem:[#allocation5] sm:$0xff]  ;;  %v187_v43 = vld [vmem:[#allocation2 + $0x10] sm:$0xff] }
  0x2c   :  { %98 = vmatprep.subr.mxu0 %v1427_v5  ;;  %228 = vmatprep.subr.mxu1 %v1427_v5  ;;  %v56_v17 = vld [vmem:[#allocation2] sm:$0xff]  ;;  %v57_v21 = vld [vmem:[#allocation2 + $0x8] sm:$0xff]  ;;  %v188_v47 = vld [vmem:[#allocation2 + $0x18] sm:$0xff]  ;;  %p1353_p4 = por %p1352_p3, %p1351_p2 }
  0x2d   :  { %99 = vmatpush1.msra.mxu0 %v1431_v6  ;;  %229 = vmatpush1.msra.mxu1 %v1431_v6  ;;  %v173_v38 = vld [vmem:[#allocation7] sm:$0xff] }
  0x2e   :  { %100 = vmatprep.subr.mxu0 %v1435_v7  ;;  %230 = vmatprep.subr.mxu1 %v1435_v7  ;;  %vm174_vm0 = vcmp.ne.f32.partialorder %v173_v38, 0.0  ;;  %p1354_p5 = pnand %p1353_p4, %p1347_p1 }
  0x2f   :  { %101 = vmatpush1.msra.mxu0 %v1439_v8  ;;  %231 = vmatpush1.msra.mxu1 %v1439_v8 }
  0x30   :  { %102 = vmatprep.subr.mxu0 %v1443_v9  ;;  %232 = vmatprep.subr.mxu1 %v1443_v9 }
  0x31   :  { %103 = vmatpush1.msra.mxu0 %v1447_v10  ;;  %233 = vmatpush1.msra.mxu1 %v1447_v10 }
  0x32   :  { %104 = vmatprep.subr.mxu0 %v1451_v11  ;;  %234 = vmatprep.subr.mxu1 %v1451_v11 }
  0x33   :  { %105 = vmatpush1.msra.mxu0 %v1455_v12  ;;  %235 = vmatpush1.msra.mxu1 %v1455_v12 }
  0x34   :  { %106 = vmatprep.subr.mxu0 %v1459_v13  ;;  %236 = vmatprep.subr.mxu1 %v1459_v13 }
  0x35   :  { %107 = vmatpush1.msra.mxu0 %v1463_v14  ;;  %237 = vmatpush1.msra.mxu1 %v1463_v14 }
  0x36   :  { %108 = vmatprep.subr.mxu0 %v1467_v15  ;;  %238 = vmatprep.subr.mxu1 %v1467_v15 }
  0x37   :  { %109 = vmatpush1.msra.mxu0 %v1471_v16  ;;  %239 = vmatpush1.msra.mxu1 %v1471_v16 }
  0x38   :  { %143 = vmatmul.mubr.f32.vlgmr.msra.gmra.mxu0 %v1379_v0  ;;  %361 = vmatprep.subr.mxu0 %v1416_v1 }
  0x39   :  { %362 = vmatpush1.msra.mxu0 %v1418_v2  ;;  %409 = vmatprep.mubr.f32.mxu0 %v1379_v0 }
  0x3a   :  { %363 = vmatprep.subr.mxu0 %v1420_v3  ;;  %498 = vmatprep.subr.mxu1 %v1416_v1 }
  0x3b   :  { %364 = vmatpush1.msra.mxu0 %v1423_v4 }
  0x3c   :  { %365 = vmatprep.subr.mxu0 %v1427_v5 }
  0x3d   :  { %366 = vmatpush1.msra.mxu0 %v1431_v6 }
  0x3e   :  { %367 = vmatprep.subr.mxu0 %v1435_v7 }
  0x3f   :  { %368 = vmatpush1.msra.mxu0 %v1439_v8 }
  0x40   :  { %369 = vmatprep.subr.mxu0 %v1443_v9 }
  0x41   :  { %370 = vmatpush1.msra.mxu0 %v1447_v10 }
  0x42   :  { %371 = vmatprep.subr.mxu0 %v1451_v11 }
  0x43   :  { %372 = vmatpush1.msra.mxu0 %v1455_v12 }
  0x44   :  { %373 = vmatprep.subr.mxu0 %v1459_v13 }
  0x45   :  { %374 = vmatpush1.msra.mxu0 %v1463_v14 }
  0x46   :  { %375 = vmatprep.subr.mxu0 %v1467_v15 }
  0x47   :  { %376 = vmatpush1.msra.mxu0 %v1471_v16 }
  0x48   :  { %635 = vmatprep.subr.mxu0 %v1416_v1 }
  0xf8   :  { %v144_v18 = vpop.f32.mrf.mxu0 }
  0xf9   :  { %v149_v19 = vadd.f32 %v144_v18, %v56_v17  ;;  %v308_v18 = vld [vmem:[#allocation7 + $0x8] sm:$0xff] }
  0xfa   :  { %v146_v22 = vpop.f32.mrf.mxu0  ;;  %vm309_vm2 = vcmp.ne.f32.partialorder %v308_v18, 0.0 }
  0xfb   :  { %v1157_v20 = vmul.f32 -1.442695, %v149_v19  ;;  %v150_v23 = vadd.f32 %v146_v22, %v57_v21 }
  0xfd   :  { %1190 = vpow2.f32 %v1157_v20  ;;  %v1158_v29 = vmul.f32 -1.442695, %v150_v23 }
  0xfe   :  { %1192 = vtanh.f32 %v150_v23 }
 0x10a   :  { %v1191_v24 = vpop.eup %1190 }
 0x10b   :  { %v154_v25 = vadd.f32 1.0, %v1191_v24  ;;  %v1193_v26 = vpop.eup %1192  ;;  %v324_v24 = vld [vmem:[#allocation2 + $0x20] sm:$0xff] }
 0x10d   :  { %1194 = vrcp.f32 %v154_v25 }
 0x10e   :  { %1196 = vpow2.f32 %v1158_v29 }
 0x11a   :  { %v1195_v27 = vpop.eup %1194 }
 0x11b   :  { %v165_v28 = vmul.f32 %v1195_v27, %v1193_v26  ;;  %v1197_v30 = vpop.eup %1196  ;;  %v164_v32 = vmul.f32 0.0, %v1195_v27 }
 0x11c   :  { %v161_v31 = vadd.f32 1.0, %v1197_v30 }
 0x11d   :  { %167 = vrot.lane.b32.xlu0 %v165_v28, %s1380_s0  ;;  %v325_v28 = vld [vmem:[#allocation2 + $0x28] sm:$0xff] }
 0x11e   :  { %1198 = vrcp.f32 %v161_v31 }
 0x12b   :  { %v1199_v35 = vpop.eup %1198 }
 0x18f   :  { %v168_v33 = vpop.permute.xlu0 %167 }
 0x190   :  { %v170_v34 = vadd.f32 %v168_v33, %v164_v32 }
 0x192   :  { %1200 = vtanh.f32 %v170_v34  ;;  %182 = vrot.lane.b32.xlu1 %v170_v34, %s1380_s0 }
 0x19f   :  { %v1201_v36 = vpop.eup %1200 }
 0x1a0   :  { %v172_v37 = vmul.f32 %v1201_v36, %v1199_v35 }
 0x1a2   :  { %176 = vrot.lane.b32.xlu0 %v172_v37, %s1380_s0 }
 0x204   :  { %v183_v39 = vpop.permute.xlu1 %182 }
 0x205   :  { %v185_v40 = vsel %vm174_vm0, %v183_v39, 0.0 }
 0x206   :  { %295 = vrot.lane.b32.xlu1 %v185_v40, %s1380_s0 }
 0x214   :  { %v177_v41 = vpop.permute.xlu0 %176 }
 0x215   :  { %v179_v42 = vsel %vm174_vm0, %v177_v41, 0.0 }
 0x216   :  { %180 = vst.msk [vmem:[#allocation8] sm:$0xff] %vm74_vm1, %v179_v42  ;;  %1159 = vmatmul.mubr.msk.f32.vlgmr.msra.gmra.mxu1 %vm74_vm1, %v179_v42 }
 0x217   :  { %499 = vmatpush1.msra.mxu1 %v1418_v2  ;;  %546 = vmatprep.mubr.f32.mxu1 %v1379_v0 }
 0x218   :  { %500 = vmatprep.subr.mxu1 %v1420_v3 }
 0x219   :  { %501 = vmatpush1.msra.mxu1 %v1423_v4 }
 0x21a   :  { %502 = vmatprep.subr.mxu1 %v1427_v5 }
 0x21b   :  { %503 = vmatpush1.msra.mxu1 %v1431_v6 }
 0x21c   :  { %504 = vmatprep.subr.mxu1 %v1435_v7 }
 0x21d   :  { %505 = vmatpush1.msra.mxu1 %v1439_v8 }
 0x21e   :  { %506 = vmatprep.subr.mxu1 %v1443_v9 }
 0x21f   :  { %507 = vmatpush1.msra.mxu1 %v1447_v10 }
 0x220   :  { %508 = vmatprep.subr.mxu1 %v1451_v11 }
 0x221   :  { %509 = vmatpush1.msra.mxu1 %v1455_v12 }
 0x222   :  { %510 = vmatprep.subr.mxu1 %v1459_v13 }
 0x223   :  { %511 = vmatpush1.msra.mxu1 %v1463_v14 }
 0x224   :  { %512 = vmatprep.subr.mxu1 %v1467_v15 }
 0x225   :  { %513 = vmatpush1.msra.mxu1 %v1471_v16 }
 0x226   :  { %772 = vmatprep.subr.mxu1 %v1416_v1 }
 0x278   :  { %v296_v57 = vpop.permute.xlu1 %295 }
 0x2d6   :  { %v274_v44 = vpop.f32.mrf.mxu1 }
 0x2d7   :  { %v279_v45 = vadd.f32 %v274_v44, %v187_v43 }
 0x2d8   :  { %v276_v48 = vpop.f32.mrf.mxu1 }
 0x2d9   :  { %v1160_v46 = vmul.f32 -1.442695, %v279_v45  ;;  %v280_v49 = vadd.f32 %v276_v48, %v188_v47 }
 0x2db   :  { %1202 = vpow2.f32 %v1160_v46  ;;  %v1161_v55 = vmul.f32 -1.442695, %v280_v49  ;;  %v445_v46 = vld [vmem:[#allocation7 + $0x10] sm:$0xff] }
 0x2dc   :  { %1204 = vtanh.f32 %v280_v49  ;;  %vm446_vm3 = vcmp.ne.f32.partialorder %v445_v46, 0.0 }
 0x2e8   :  { %v1203_v50 = vpop.eup %1202 }
 0x2e9   :  { %v284_v51 = vadd.f32 1.0, %v1203_v50  ;;  %v1205_v52 = vpop.eup %1204 }
 0x2eb   :  { %1206 = vrcp.f32 %v284_v51 }
 0x2ec   :  { %1208 = vpow2.f32 %v1161_v55 }
 0x2f8   :  { %v1207_v53 = vpop.eup %1206 }
 0x2f9   :  { %v299_v54 = vmul.f32 %v1207_v53, %v1205_v52  ;;  %v1209_v56 = vpop.eup %1208  ;;  %v298_v59 = vmul.f32 %v1207_v53, %v296_v57  ;;  %v461_v52 = vld [vmem:[#allocation2 + $0x30] sm:$0xff] }
 0x2fa   :  { %v291_v58 = vadd.f32 1.0, %v1209_v56  ;;  %v462_v56 = vld [vmem:[#allocation2 + $0x38] sm:$0xff] }
 0x2fb   :  { %301 = vrot.lane.b32.xlu0 %v299_v54, %s1380_s0 }
 0x2fc   :  { %1210 = vrcp.f32 %v291_v58 }
 0x309   :  { %v1211_v62 = vpop.eup %1210 }
 0x36d   :  { %v302_v60 = vpop.permute.xlu0 %301 }
 0x36e   :  { %v304_v61 = vadd.f32 %v302_v60, %v298_v59 }
 0x370   :  { %1212 = vtanh.f32 %v304_v61  ;;  %319 = vrot.lane.b32.xlu0 %v304_v61, %s1380_s0 }
 0x37d   :  { %v1213_v63 = vpop.eup %1212 }
 0x37e   :  { %v306_v17 = vmul.f32 %v1213_v63, %v1211_v62 }
 0x380   :  { %311 = vrot.lane.b32.xlu1 %v306_v17, %s1380_s0 }
 0x3e2   :  { %v320_v19 = vpop.permute.xlu0 %319 }
 0x3e3   :  { %v322_v20 = vsel %vm309_vm2, %v320_v19, %v185_v40 }
 0x3e4   :  { %432 = vrot.lane.b32.xlu1 %v322_v20, %s1380_s0 }
 0x3f2   :  { %v312_v21 = vpop.permute.xlu1 %311 }
 0x3f3   :  { %v314_v22 = vsel %vm309_vm2, %v312_v21, 0.0  ;;  %v317_v23 = vsel %vm309_vm2, %v312_v21, %v179_v42 }
 0x3f4   :  { %316 = vst.msk [vmem:[#allocation8 + $0x8] sm:$0xff] %vm74_vm1, %v314_v22  ;;  %1162 = vmatmul.mubr.msk.f32.vlgmr.msra.gmra.mxu0 %vm74_vm1, %v317_v23 }
 0x3f5   :  { %636 = vmatpush1.msra.mxu0 %v1418_v2  ;;  %683 = vmatprep.mubr.f32.mxu0 %v1379_v0 }
 0x3f6   :  { %637 = vmatprep.subr.mxu0 %v1420_v3 }
 0x3f7   :  { %638 = vmatpush1.msra.mxu0 %v1423_v4 }
 0x3f8   :  { %639 = vmatprep.subr.mxu0 %v1427_v5 }
 0x3f9   :  { %640 = vmatpush1.msra.mxu0 %v1431_v6 }
 0x3fa   :  { %641 = vmatprep.subr.mxu0 %v1435_v7 }
 0x3fb   :  { %642 = vmatpush1.msra.mxu0 %v1439_v8 }
 0x3fc   :  { %643 = vmatprep.subr.mxu0 %v1443_v9 }
 0x3fd   :  { %644 = vmatpush1.msra.mxu0 %v1447_v10 }
 0x3fe   :  { %645 = vmatprep.subr.mxu0 %v1451_v11 }
 0x3ff   :  { %646 = vmatpush1.msra.mxu0 %v1455_v12 }
 0x400   :  { %647 = vmatprep.subr.mxu0 %v1459_v13 }
 0x401   :  { %648 = vmatpush1.msra.mxu0 %v1463_v14 }
 0x402   :  { %649 = vmatprep.subr.mxu0 %v1467_v15 }
 0x403   :  { %650 = vmatpush1.msra.mxu0 %v1471_v16 }
 0x404   :  { %909 = vmatprep.subr.mxu0 %v1416_v1 }
 0x456   :  { %v433_v38 = vpop.permute.xlu1 %432 }
 0x4b4   :  { %v411_v25 = vpop.f32.mrf.mxu0 }
 0x4b5   :  { %v416_v26 = vadd.f32 %v411_v25, %v324_v24 }
 0x4b6   :  { %v413_v29 = vpop.f32.mrf.mxu0 }
 0x4b7   :  { %v1163_v27 = vmul.f32 -1.442695, %v416_v26  ;;  %v417_v30 = vadd.f32 %v413_v29, %v325_v28  ;;  %v582_v26 = vld [vmem:[#allocation7 + $0x18] sm:$0xff] }
 0x4b8   :  { %vm583_vm4 = vcmp.ne.f32.partialorder %v582_v26, 0.0 }
 0x4b9   :  { %1214 = vpow2.f32 %v1163_v27  ;;  %v1164_v36 = vmul.f32 -1.442695, %v417_v30 }
 0x4ba   :  { %1216 = vtanh.f32 %v417_v30 }
 0x4c6   :  { %v1215_v31 = vpop.eup %1214 }
 0x4c7   :  { %v421_v32 = vadd.f32 1.0, %v1215_v31  ;;  %v1217_v33 = vpop.eup %1216 }
 0x4c9   :  { %1218 = vrcp.f32 %v421_v32  ;;  %v598_v32 = vld [vmem:[#allocation2 + $0x40] sm:$0xff] }
 0x4ca   :  { %1220 = vpow2.f32 %v1164_v36  ;;  %v599_v36 = vld [vmem:[#allocation2 + $0x48] sm:$0xff] }
 0x4d6   :  { %v1219_v34 = vpop.eup %1218 }
 0x4d7   :  { %v436_v35 = vmul.f32 %v1219_v34, %v1217_v33  ;;  %v1221_v37 = vpop.eup %1220  ;;  %v435_v40 = vmul.f32 %v1219_v34, %v433_v38 }
 0x4d8   :  { %v428_v39 = vadd.f32 1.0, %v1221_v37 }
 0x4d9   :  { %438 = vrot.lane.b32.xlu0 %v436_v35, %s1380_s0 }
 0x4da   :  { %1222 = vrcp.f32 %v428_v39 }
 0x4e7   :  { %v1223_v43 = vpop.eup %1222 }
 0x54b   :  { %v439_v41 = vpop.permute.xlu0 %438 }
 0x54c   :  { %v441_v42 = vadd.f32 %v439_v41, %v435_v40 }
 0x54e   :  { %1224 = vtanh.f32 %v441_v42  ;;  %456 = vrot.lane.b32.xlu0 %v441_v42, %s1380_s0 }
 0x55b   :  { %v1225_v44 = vpop.eup %1224 }
 0x55c   :  { %v443_v45 = vmul.f32 %v1225_v44, %v1223_v43 }
 0x55e   :  { %448 = vrot.lane.b32.xlu1 %v443_v45, %s1380_s0 }
 0x5c0   :  { %v457_v47 = vpop.permute.xlu0 %456 }
 0x5c1   :  { %v459_v48 = vsel %vm446_vm3, %v457_v47, %v322_v20 }
 0x5c2   :  { %569 = vrot.lane.b32.xlu1 %v459_v48, %s1380_s0 }
 0x5d0   :  { %v449_v49 = vpop.permute.xlu1 %448 }
 0x5d1   :  { %v451_v50 = vsel %vm446_vm3, %v449_v49, 0.0  ;;  %v454_v51 = vsel %vm446_vm3, %v449_v49, %v317_v23 }
 0x5d2   :  { %453 = vst.msk [vmem:[#allocation8 + $0x10] sm:$0xff] %vm74_vm1, %v451_v50  ;;  %1165 = vmatmul.mubr.msk.f32.vlgmr.msra.gmra.mxu1 %vm74_vm1, %v454_v51 }
 0x5d3   :  { %773 = vmatpush1.msra.mxu1 %v1418_v2  ;;  %820 = vmatprep.mubr.f32.mxu1 %v1379_v0 }
 0x5d4   :  { %774 = vmatprep.subr.mxu1 %v1420_v3 }
 0x5d5   :  { %775 = vmatpush1.msra.mxu1 %v1423_v4 }
 0x5d6   :  { %776 = vmatprep.subr.mxu1 %v1427_v5 }
 0x5d7   :  { %777 = vmatpush1.msra.mxu1 %v1431_v6 }
 0x5d8   :  { %778 = vmatprep.subr.mxu1 %v1435_v7 }
 0x5d9   :  { %779 = vmatpush1.msra.mxu1 %v1439_v8 }
 0x5da   :  { %780 = vmatprep.subr.mxu1 %v1443_v9 }
 0x5db   :  { %781 = vmatpush1.msra.mxu1 %v1447_v10 }
 0x5dc   :  { %782 = vmatprep.subr.mxu1 %v1451_v11 }
 0x5dd   :  { %783 = vmatpush1.msra.mxu1 %v1455_v12 }
 0x5de   :  { %784 = vmatprep.subr.mxu1 %v1459_v13 }
 0x5df   :  { %785 = vmatpush1.msra.mxu1 %v1463_v14 }
 0x5e0   :  { %786 = vmatprep.subr.mxu1 %v1467_v15 }
 0x5e1   :  { %787 = vmatpush1.msra.mxu1 %v1471_v16 }
 0x5e2   :  { %1046 = vmatprep.subr.mxu1 %v1416_v1 }
 0x634   :  { %v570_v18 = vpop.permute.xlu1 %569 }
 0x692   :  { %v548_v53 = vpop.f32.mrf.mxu1 }
 0x693   :  { %v553_v54 = vadd.f32 %v548_v53, %v461_v52 }
 0x694   :  { %v550_v57 = vpop.f32.mrf.mxu1 }
 0x695   :  { %v1166_v55 = vmul.f32 -1.442695, %v553_v54  ;;  %v554_v58 = vadd.f32 %v550_v57, %v462_v56  ;;  %v719_v54 = vld [vmem:[#allocation7 + $0x20] sm:$0xff] }
 0x696   :  { %vm720_vm5 = vcmp.ne.f32.partialorder %v719_v54, 0.0 }
 0x697   :  { %1226 = vpow2.f32 %v1166_v55  ;;  %v1167_v17 = vmul.f32 -1.442695, %v554_v58 }
 0x698   :  { %1228 = vtanh.f32 %v554_v58 }
 0x6a4   :  { %v1227_v59 = vpop.eup %1226 }
 0x6a5   :  { %v558_v60 = vadd.f32 1.0, %v1227_v59  ;;  %v1229_v61 = vpop.eup %1228 }
 0x6a7   :  { %1230 = vrcp.f32 %v558_v60 }
 0x6a8   :  { %1232 = vpow2.f32 %v1167_v17 }
 0x6b4   :  { %v1231_v62 = vpop.eup %1230 }
 0x6b5   :  { %v573_v63 = vmul.f32 %v1231_v62, %v1229_v61  ;;  %v1233_v1 = vpop.eup %1232  ;;  %v572_v20 = vmul.f32 %v1231_v62, %v570_v18  ;;  %v856_v18 = vld [vmem:[#allocation7 + $0x28] sm:$0xff] }
 0x6b6   :  { %v565_v19 = vadd.f32 1.0, %v1233_v1  ;;  %vm857_vm6 = vcmp.ne.f32.partialorder %v856_v18, 0.0 }
 0x6b7   :  { %575 = vrot.lane.b32.xlu0 %v573_v63, %s1380_s0 }
 0x6b8   :  { %1234 = vrcp.f32 %v565_v19 }
 0x6c5   :  { %v1235_v23 = vpop.eup %1234 }
 0x729   :  { %v576_v21 = vpop.permute.xlu0 %575 }
 0x72a   :  { %v578_v22 = vadd.f32 %v576_v21, %v572_v20 }
 0x72c   :  { %1236 = vtanh.f32 %v578_v22  ;;  %593 = vrot.lane.b32.xlu0 %v578_v22, %s1380_s0 }
 0x739   :  { %v1237_v24 = vpop.eup %1236 }
 0x73a   :  { %v580_v25 = vmul.f32 %v1237_v24, %v1235_v23  ;;  %v872_v24 = vld [vmem:[#allocation2 + $0x60] sm:$0xff] }
 0x73c   :  { %585 = vrot.lane.b32.xlu1 %v580_v25, %s1380_s0 }
 0x79e   :  { %v594_v27 = vpop.permute.xlu0 %593 }
 0x79f   :  { %v596_v28 = vsel %vm583_vm4, %v594_v27, %v459_v48 }
 0x7a0   :  { %706 = vrot.lane.b32.xlu1 %v596_v28, %s1380_s0 }
 0x7ae   :  { %v586_v29 = vpop.permute.xlu1 %585 }
 0x7af   :  { %v588_v30 = vsel %vm583_vm4, %v586_v29, 0.0  ;;  %v591_v31 = vsel %vm583_vm4, %v586_v29, %v454_v51 }
 0x7b0   :  { %590 = vst.msk [vmem:[#allocation8 + $0x18] sm:$0xff] %vm74_vm1, %v588_v30  ;;  %1168 = vmatmul.mubr.msk.f32.vlgmr.msra.gmra.mxu0 %vm74_vm1, %v591_v31 }
 0x7b1   :  { %910 = vmatpush1.msra.mxu0 %v1418_v2  ;;  %957 = vmatprep.mubr.f32.mxu0 %v1379_v0 }
 0x7b2   :  { %911 = vmatprep.subr.mxu0 %v1420_v3 }
 0x7b3   :  { %912 = vmatpush1.msra.mxu0 %v1423_v4 }
 0x7b4   :  { %913 = vmatprep.subr.mxu0 %v1427_v5 }
 0x7b5   :  { %914 = vmatpush1.msra.mxu0 %v1431_v6 }
 0x7b6   :  { %915 = vmatprep.subr.mxu0 %v1435_v7 }
 0x7b7   :  { %916 = vmatpush1.msra.mxu0 %v1439_v8 }
 0x7b8   :  { %917 = vmatprep.subr.mxu0 %v1443_v9 }
 0x7b9   :  { %918 = vmatpush1.msra.mxu0 %v1447_v10 }
 0x7ba   :  { %919 = vmatprep.subr.mxu0 %v1451_v11 }
 0x7bb   :  { %920 = vmatpush1.msra.mxu0 %v1455_v12 }
 0x7bc   :  { %921 = vmatprep.subr.mxu0 %v1459_v13 }
 0x7bd   :  { %922 = vmatpush1.msra.mxu0 %v1463_v14 }
 0x7be   :  { %923 = vmatprep.subr.mxu0 %v1467_v15 }
 0x7bf   :  { %924 = vmatpush1.msra.mxu0 %v1471_v16 }
 0x812   :  { %v707_v46 = vpop.permute.xlu1 %706 }
 0x870   :  { %v685_v33 = vpop.f32.mrf.mxu0 }
 0x871   :  { %v690_v34 = vadd.f32 %v685_v33, %v598_v32 }
 0x872   :  { %v687_v37 = vpop.f32.mrf.mxu0 }
 0x873   :  { %v1169_v35 = vmul.f32 -1.442695, %v690_v34  ;;  %v691_v38 = vadd.f32 %v687_v37, %v599_v36 }
 0x875   :  { %1238 = vpow2.f32 %v1169_v35  ;;  %v1170_v44 = vmul.f32 -1.442695, %v691_v38 }
 0x876   :  { %1240 = vtanh.f32 %v691_v38 }
 0x882   :  { %v1239_v39 = vpop.eup %1238 }
 0x883   :  { %v695_v40 = vadd.f32 1.0, %v1239_v39  ;;  %v1241_v41 = vpop.eup %1240 }
 0x885   :  { %1242 = vrcp.f32 %v695_v40 }
 0x886   :  { %1244 = vpow2.f32 %v1170_v44 }
 0x892   :  { %v1243_v42 = vpop.eup %1242 }
 0x893   :  { %v710_v43 = vmul.f32 %v1243_v42, %v1241_v41  ;;  %v1245_v45 = vpop.eup %1244  ;;  %v709_v48 = vmul.f32 %v1243_v42, %v707_v46  ;;  %v993_v46 = vld [vmem:[#allocation7 + $0x30] sm:$0xff] }
 0x894   :  { %v702_v47 = vadd.f32 1.0, %v1245_v45  ;;  %vm994_vm7 = vcmp.ne.f32.partialorder %v993_v46, 0.0 }
 0x895   :  { %712 = vrot.lane.b32.xlu0 %v710_v43, %s1380_s0 }
 0x896   :  { %1246 = vrcp.f32 %v702_v47 }
 0x8a3   :  { %v1247_v51 = vpop.eup %1246 }
 0x907   :  { %v713_v49 = vpop.permute.xlu0 %712 }
 0x908   :  { %v715_v50 = vadd.f32 %v713_v49, %v709_v48 }
 0x90a   :  { %1248 = vtanh.f32 %v715_v50  ;;  %730 = vrot.lane.b32.xlu0 %v715_v50, %s1380_s0 }
 0x917   :  { %v1249_v52 = vpop.eup %1248 }
 0x918   :  { %v717_v53 = vmul.f32 %v1249_v52, %v1247_v51  ;;  %v1009_v52 = vld [vmem:[#allocation2 + $0x70] sm:$0xff] }
 0x91a   :  { %722 = vrot.lane.b32.xlu1 %v717_v53, %s1380_s0 }
 0x97c   :  { %v731_v55 = vpop.permute.xlu0 %730 }
 0x97d   :  { %v733_v56 = vsel %vm720_vm5, %v731_v55, %v596_v28  ;;  %v873_v28 = vld [vmem:[#allocation2 + $0x68] sm:$0xff] }
 0x97e   :  { %843 = vrot.lane.b32.xlu1 %v733_v56, %s1380_s0 }
 0x98c   :  { %v723_v57 = vpop.permute.xlu1 %722 }
 0x98d   :  { %v725_v58 = vsel %vm720_vm5, %v723_v57, 0.0  ;;  %v728_v59 = vsel %vm720_vm5, %v723_v57, %v591_v31 }
 0x98e   :  { %727 = vst.msk [vmem:[#allocation8 + $0x20] sm:$0xff] %vm74_vm1, %v725_v58  ;;  %1171 = vmatmul.mubr.msk.f32.vlgmr.msra.gmra.mxu1 %vm74_vm1, %v728_v59 }
 0x98f   :  { %1047 = vmatpush1.msra.mxu1 %v1418_v2  ;;  %1094 = vmatprep.mubr.f32.mxu1 %v1379_v0  ;;  %v735_v0 = vld [vmem:[#allocation2 + $0x50] sm:$0xff] }
 0x990   :  { %1048 = vmatprep.subr.mxu1 %v1420_v3 }
 0x991   :  { %1049 = vmatpush1.msra.mxu1 %v1423_v4 }
 0x992   :  { %1050 = vmatprep.subr.mxu1 %v1427_v5  ;;  %v736_v5 = vld [vmem:[#allocation2 + $0x58] sm:$0xff] }
 0x993   :  { %1051 = vmatpush1.msra.mxu1 %v1431_v6 }
 0x994   :  { %1052 = vmatprep.subr.mxu1 %v1435_v7 }
 0x995   :  { %1053 = vmatpush1.msra.mxu1 %v1439_v8 }
 0x996   :  { %1054 = vmatprep.subr.mxu1 %v1443_v9 }
 0x997   :  { %1055 = vmatpush1.msra.mxu1 %v1447_v10 }
 0x998   :  { %1056 = vmatprep.subr.mxu1 %v1451_v11 }
 0x999   :  { %1057 = vmatpush1.msra.mxu1 %v1455_v12 }
 0x99a   :  { %1058 = vmatprep.subr.mxu1 %v1459_v13 }
 0x99b   :  { %1059 = vmatpush1.msra.mxu1 %v1463_v14 }
 0x99c   :  { %1060 = vmatprep.subr.mxu1 %v1467_v15 }
 0x99d   :  { %1061 = vmatpush1.msra.mxu1 %v1471_v16 }
 0x9f0   :  { %v844_v15 = vpop.permute.xlu1 %843 }
 0xa4e   :  { %v822_v2 = vpop.f32.mrf.mxu1 }
 0xa4f   :  { %v827_v3 = vadd.f32 %v822_v2, %v735_v0 }
 0xa50   :  { %v824_v6 = vpop.f32.mrf.mxu1 }
 0xa51   :  { %v1172_v4 = vmul.f32 -1.442695, %v827_v3  ;;  %v828_v7 = vadd.f32 %v824_v6, %v736_v5 }
 0xa53   :  { %1250 = vpow2.f32 %v1172_v4  ;;  %v1173_v13 = vmul.f32 -1.442695, %v828_v7 }
 0xa54   :  { %1252 = vtanh.f32 %v828_v7 }
 0xa60   :  { %v1251_v8 = vpop.eup %1250 }
 0xa61   :  { %v832_v9 = vadd.f32 1.0, %v1251_v8  ;;  %v1253_v10 = vpop.eup %1252 }
 0xa63   :  { %1254 = vrcp.f32 %v832_v9 }
 0xa64   :  { %1256 = vpow2.f32 %v1173_v13 }
 0xa70   :  { %v1255_v11 = vpop.eup %1254 }
 0xa71   :  { %v847_v12 = vmul.f32 %v1255_v11, %v1253_v10  ;;  %v1257_v14 = vpop.eup %1256  ;;  %v846_v60 = vmul.f32 %v1255_v11, %v844_v15  ;;  %v1130_v15 = vld [vmem:[#allocation7 + $0x38] sm:$0xff] }
 0xa72   :  { %v839_v16 = vadd.f32 1.0, %v1257_v14  ;;  %vm1131_vm8 = vcmp.ne.f32.partialorder %v1130_v15, 0.0 }
 0xa73   :  { %849 = vrot.lane.b32.xlu0 %v847_v12, %s1380_s0 }
 0xa74   :  { %1258 = vrcp.f32 %v839_v16 }
 0xa81   :  { %v1259_v63 = vpop.eup %1258 }
 0xae5   :  { %v850_v61 = vpop.permute.xlu0 %849 }
 0xae6   :  { %v852_v62 = vadd.f32 %v850_v61, %v846_v60 }
 0xae8   :  { %1260 = vtanh.f32 %v852_v62  ;;  %867 = vrot.lane.b32.xlu0 %v852_v62, %s1380_s0 }
 0xaf5   :  { %v1261_v17 = vpop.eup %1260 }
 0xaf6   :  { %v854_v1 = vmul.f32 %v1261_v17, %v1259_v63 }
 0xaf8   :  { %859 = vrot.lane.b32.xlu1 %v854_v1, %s1380_s0 }
 0xb5a   :  { %v868_v19 = vpop.permute.xlu0 %867 }
 0xb5b   :  { %v870_v20 = vsel %vm857_vm6, %v868_v19, %v733_v56  ;;  %v1010_v56 = vld [vmem:[#allocation2 + $0x78] sm:$0xff] }
 0xb5c   :  { %980 = vrot.lane.b32.xlu1 %v870_v20, %s1380_s0 }
 0xb6a   :  { %v860_v21 = vpop.permute.xlu1 %859 }
 0xb6b   :  { %v862_v22 = vsel %vm857_vm6, %v860_v21, 0.0  ;;  %v865_v23 = vsel %vm857_vm6, %v860_v21, %v728_v59 }
 0xb6c   :  { %864 = vst.msk [vmem:[#allocation8 + $0x28] sm:$0xff] %vm74_vm1, %v862_v22  ;;  %1174 = vmatmul.mubr.msk.f32.vlgmr.msra.gmra.mxu0 %vm74_vm1, %v865_v23 }
 0xbce   :  { %v981_v38 = vpop.permute.xlu1 %980 }
 0xc2c   :  { %v959_v25 = vpop.f32.mrf.mxu0 }
 0xc2d   :  { %v964_v26 = vadd.f32 %v959_v25, %v872_v24 }
 0xc2e   :  { %v961_v29 = vpop.f32.mrf.mxu0 }
 0xc2f   :  { %v1175_v27 = vmul.f32 -1.442695, %v964_v26  ;;  %v965_v30 = vadd.f32 %v961_v29, %v873_v28 }
 0xc31   :  { %1262 = vpow2.f32 %v1175_v27  ;;  %v1176_v36 = vmul.f32 -1.442695, %v965_v30 }
 0xc32   :  { %1264 = vtanh.f32 %v965_v30 }
 0xc3e   :  { %v1263_v31 = vpop.eup %1262 }
 0xc3f   :  { %v969_v32 = vadd.f32 1.0, %v1263_v31  ;;  %v1265_v33 = vpop.eup %1264 }
 0xc41   :  { %1266 = vrcp.f32 %v969_v32 }
 0xc42   :  { %1268 = vpow2.f32 %v1176_v36 }
 0xc4e   :  { %v1267_v34 = vpop.eup %1266 }
 0xc4f   :  { %v984_v35 = vmul.f32 %v1267_v34, %v1265_v33  ;;  %v1269_v37 = vpop.eup %1268  ;;  %v983_v40 = vmul.f32 %v1267_v34, %v981_v38 }
 0xc50   :  { %v976_v39 = vadd.f32 1.0, %v1269_v37 }
 0xc51   :  { %986 = vrot.lane.b32.xlu0 %v984_v35, %s1380_s0 }
 0xc52   :  { %1270 = vrcp.f32 %v976_v39 }
 0xc5f   :  { %v1271_v43 = vpop.eup %1270 }
 0xcc3   :  { %v987_v41 = vpop.permute.xlu0 %986 }
 0xcc4   :  { %v989_v42 = vadd.f32 %v987_v41, %v983_v40 }
 0xcc6   :  { %1272 = vtanh.f32 %v989_v42  ;;  %1004 = vrot.lane.b32.xlu0 %v989_v42, %s1380_s0 }
 0xcd3   :  { %v1273_v44 = vpop.eup %1272 }
 0xcd4   :  { %v991_v45 = vmul.f32 %v1273_v44, %v1271_v43 }
 0xcd6   :  { %996 = vrot.lane.b32.xlu1 %v991_v45, %s1380_s0 }
 0xd38   :  { %v1005_v47 = vpop.permute.xlu0 %1004 }
 0xd39   :  { %v1007_v48 = vsel %vm994_vm7, %v1005_v47, %v870_v20 }
 0xd3a   :  { %1117 = vrot.lane.b32.xlu1 %v1007_v48, %s1380_s0 }
 0xd48   :  { %v997_v49 = vpop.permute.xlu1 %996 }
 0xd49   :  { %v999_v50 = vsel %vm994_vm7, %v997_v49, 0.0  ;;  %v1002_v51 = vsel %vm994_vm7, %v997_v49, %v865_v23 }
 0xd4a   :  { %1001 = vst.msk [vmem:[#allocation8 + $0x30] sm:$0xff] %vm74_vm1, %v999_v50  ;;  %1177 = vmatmul.mubr.msk.f32.vlgmr.msra.gmra.mxu1 %vm74_vm1, %v1002_v51 }
 0xdac   :  { %v1118_v7 = vpop.permute.xlu1 %1117 }
 0xe0a   :  { %v1096_v53 = vpop.f32.mrf.mxu1 }
 0xe0b   :  { %v1101_v54 = vadd.f32 %v1096_v53, %v1009_v52 }
 0xe0c   :  { %v1098_v57 = vpop.f32.mrf.mxu1 }
 0xe0d   :  { %v1178_v55 = vmul.f32 -1.442695, %v1101_v54  ;;  %v1102_v58 = vadd.f32 %v1098_v57, %v1010_v56 }
 0xe0f   :  { %1274 = vpow2.f32 %v1178_v55  ;;  %v1179_v5 = vmul.f32 -1.442695, %v1102_v58 }
 0xe10   :  { %1276 = vtanh.f32 %v1102_v58 }
 0xe1c   :  { %v1275_v59 = vpop.eup %1274 }
 0xe1d   :  { %v1106_v0 = vadd.f32 1.0, %v1275_v59  ;;  %v1277_v2 = vpop.eup %1276 }
 0xe1f   :  { %1278 = vrcp.f32 %v1106_v0 }
 0xe20   :  { %1280 = vpow2.f32 %v1179_v5 }
 0xe2c   :  { %v1279_v3 = vpop.eup %1278 }
 0xe2d   :  { %v1121_v4 = vmul.f32 %v1279_v3, %v1277_v2  ;;  %v1281_v6 = vpop.eup %1280  ;;  %v1120_v9 = vmul.f32 %v1279_v3, %v1118_v7 }
 0xe2e   :  { %v1113_v8 = vadd.f32 1.0, %v1281_v6 }
 0xe2f   :  { %1123 = vrot.lane.b32.xlu0 %v1121_v4, %s1380_s0 }
 0xe30   :  { %1282 = vrcp.f32 %v1113_v8 }
 0xe3d   :  { %v1283_v12 = vpop.eup %1282 }
 0xea1   :  { %v1124_v10 = vpop.permute.xlu0 %1123 }
 0xea2   :  { %v1126_v11 = vadd.f32 %v1124_v10, %v1120_v9 }
 0xea4   :  { %1284 = vtanh.f32 %v1126_v11 }
 0xeb1   :  { %v1285_v13 = vpop.eup %1284 }
 0xeb2   :  { %v1128_v14 = vmul.f32 %v1285_v13, %v1283_v12 }
 0xeb4   :  { %1133 = vrot.lane.b32.xlu1 %v1128_v14, %s1380_s0 }
 0xf26   :  { %v1134_v16 = vpop.permute.xlu1 %1133 }
 0xf27   :  { %v1136_v60 = vsel %vm1131_vm8, %v1134_v16, 0.0 }
 0xf28   :  { %1138 = vst.msk [vmem:[#allocation8 + $0x38] sm:$0xff] %vm74_vm1, %v1136_v60 }
 0xf29   :  { %1357 = shalt.err (!%p1354_p5)
}
 0xf2a   :  { %1150 = dma.vmem_to_hbm [thread:$0]  %s1145_s30, 1024, %s1637_s3, [#allocation4], %s1377_s1, %s1377_s1, %s1378_s27  }
 0xf2b   :  { %1370 = dma.done.wait [#allocation4], 1024  }
 0xf2c   :  { %1371 = vsyncadd [#allocation4], 4294966272 }
 0xf2d   :  { %1154 = vsyncpa [#allocation3], 1 }
 0xf2e   :  { %1155 = vsyncpa [#allocation6], 1 }
 0xf2f   :  { %1156 = vsyncpa [#allocation4], 1 }

</bundles_post_ra>
